<compile_context>
chip_gen: v7x
topology: tpu7x:2x2x1
jax: 0.10.0
libtpu: 0.0.40
codegen_flags: <defaults>
</compile_context>

<pallas_src>
import functools
import math

import jax
import jax.numpy as jnp
from jax import lax
from jax.experimental import pallas as pl
from jax.experimental.pallas import tpu as pltpu


# ----------------------------------------------------------------------------
# In-kernel helpers
# ----------------------------------------------------------------------------
def _layer_norm(x, w, b, eps=1e-5):
    # PyTorch LayerNorm: biased variance over the last dim, f32 math.
    mu = jnp.mean(x, axis=-1, keepdims=True)
    xc = x - mu
    var = jnp.mean(xc * xc, axis=-1, keepdims=True)
    return xc * lax.rsqrt(var + eps) * w + b


def _split_heads(t, B, S, H, Dh):
    # (B*S, E) -> (B*H, S, Dh).  One lane-layout-aware transpose per tensor per
    # layer (einshape) replaces the 3H non-aligned lane slices of the old code.
    t4 = t.reshape(B, S, H, Dh)
    t4 = pltpu.einshape("bshd->bhsd", t4)
    return t4.reshape(B * H, S, Dh)


def _merge_heads(t, B, S, H, Dh):
    # (B*H, S, Dh) -> (B*S, E)
    t4 = t.reshape(B, H, S, Dh)
    t4 = pltpu.einshape("bhsd->bshd", t4)
    return t4.reshape(B * S, H * Dh)


def _stack_kernel(B, S, nhead,
                  x_hbm,
                  wqkv_ref, bqkv_ref, wo_ref, bo_ref,
                  ln1w_ref, ln1b_ref,
                  w1_ref, b1_ref, w2_ref, b2_ref,
                  ln2w_ref, ln2b_ref,
                  onw_ref, onb_ref,
                  o_ref,
                  act_ref):
    """Grid step = one transformer layer; activation resident in VMEM scratch."""
    layer = pl.program_id(0)
    E = act_ref.shape[1]
    H = nhead
    Dh = E // H
    scale = 1.0 / math.sqrt(Dh)

    # Load the activation from HBM into the resident scratch once (layer 0).
    # x is NOT pinned as a pipelined VMEM input — it stays in HBM (pl.ANY).
    @pl.when(layer == 0)
    def _():
        pltpu.sync_copy(x_hbm, act_ref)

    x2 = act_ref[...]                                   # (B*S, E) f32
    xb = x2.astype(jnp.bfloat16)

    # ---- fused QKV projection: one bf16 MXU pass, f32 accumulation ----------
    qkv = jnp.dot(xb, wqkv_ref[0],
                  preferred_element_type=jnp.float32) + bqkv_ref[0]   # (B*S, 3E)

    # ---- batched-head causal self-attention ----------------------------------
    q = _split_heads(qkv[:, :E] * scale, B, S, H, Dh).astype(jnp.bfloat16)
    k = _split_heads(qkv[:, E:2 * E], B, S, H, Dh).astype(jnp.bfloat16)
    v = _split_heads(qkv[:, 2 * E:], B, S, H, Dh).astype(jnp.bfloat16)

    # Causal mask built in-kernel (cheap VPU work, no (S,S) HBM operand / VMEM).
    row = lax.broadcasted_iota(jnp.int32, (S, S), 0)
    col = lax.broadcasted_iota(jnp.int32, (S, S), 1)
    causal = col <= row                                 # (S, S) bool

    s = jnp.einsum('bqd,bkd->bqk', q, k,
                   preferred_element_type=jnp.float32)  # (B*H, S, S)
    s = jnp.where(causal[None, :, :], s, -1e30)
    m = jnp.max(s, axis=-1, keepdims=True)
    p = jnp.exp(s - m)                                  # un-normalized probs
    l = jnp.sum(p, axis=-1, keepdims=True)
    ctx = jnp.einsum('bqk,bkd->bqd', p.astype(jnp.bfloat16), v,
                     preferred_element_type=jnp.float32)        # (B*H, S, Dh)
    # Normalize AFTER the PV matmul (S/Dh x fewer VALU ops than scaling p).
    ctx = ctx * pl.reciprocal(l, approx=True)

    ctx2 = _merge_heads(ctx, B, S, H, Dh).astype(jnp.bfloat16)  # (B*S, E)
    attn = jnp.dot(ctx2, wo_ref[0],
                   preferred_element_type=jnp.float32) + bo_ref[0]

    # TODO(synk): dropout / dropout1 / dropout2 are identity (eval semantics).
    y = _layer_norm(x2 + attn, ln1w_ref[0], ln1b_ref[0])

    # ---- feed-forward (bf16 matmuls, f32 accumulate; relu) -------------------
    h1 = jnp.dot(y.astype(jnp.bfloat16), w1_ref[0],
                 preferred_element_type=jnp.float32) + b1_ref[0]
    h1 = jnp.maximum(h1, 0.0)
    h2 = jnp.dot(h1.astype(jnp.bfloat16), w2_ref[0],
                 preferred_element_type=jnp.float32) + b2_ref[0]
    y = _layer_norm(y + h2, ln2w_ref[0], ln2b_ref[0])

    act_ref[...] = y

    # Final LayerNorm fused into the last layer's grid step; the output block
    # has a constant index_map so it is DMA'd back to HBM exactly once.
    @pl.when(layer == pl.num_programs(0) - 1)
    def _():
        o_ref[...] = _layer_norm(y, onw_ref[...], onb_ref[...])


# ----------------------------------------------------------------------------
# pallas_call wrapper
# ----------------------------------------------------------------------------
def _pick_vmem_limit():
    # Per-generation VMEM budget (~85% of physical); fall back to Mosaic default.
    try:
        info = pltpu.get_tpu_info()
        cap = getattr(info, 'vmem_capacity_bytes', None)
        if not cap:
            return None
        return max(32 * 1024 * 1024, min(int(cap * 0.85), 120 * 1024 * 1024))
    except Exception:
        return None


def decoder_only_transformer_forward(x_sbe, params, nhead):
    """x_sbe: (S, B, E) float32 — same axis convention as the PyTorch module."""
    d_model = params['wqkv'].shape[1]
    if x_sbe.shape[2] != d_model:
        raise RuntimeError('the feature number of src and tgt must be equal to d_model')
    S, B, E = x_sbe.shape
    L = params['wqkv'].shape[0]

    # The (S,B,E)<->(B,S,E) layout swaps stay outside the kernel (done once per
    # forward, not once per layer).
    x = jnp.transpose(x_sbe, (1, 0, 2)).astype(jnp.float32).reshape(B * S, E)

    def replicated(shape):
        return pl.BlockSpec(shape, lambda l, _n=len(shape): (0,) * _n)

    def per_layer(shape):
        return pl.BlockSpec((1,) + shape[1:],
                            lambda l, _n=len(shape): (l,) + (0,) * (_n - 1))

    in_specs = [
        pl.BlockSpec(memory_space=pl.ANY),      # x: stays in HBM, DMA'd once
        per_layer(params['wqkv'].shape),        # (L, E, 3E) bf16
        per_layer(params['bqkv'].shape),        # (L, 1, 3E) f32
        per_layer(params['wo'].shape),          # (L, E, E) bf16
        per_layer(params['bo'].shape),          # (L, 1, E)
        per_layer(params['ln1w'].shape),
        per_layer(params['ln1b'].shape),
        per_layer(params['w1'].shape),          # (L, E, F) bf16
        per_layer(params['b1'].shape),
        per_layer(params['w2'].shape),          # (L, F, E) bf16
        per_layer(params['b2'].shape),
        per_layer(params['ln2w'].shape),
        per_layer(params['ln2b'].shape),
        replicated(params['onw'].shape),
        replicated(params['onb'].shape),
    ]

    out = pl.pallas_call(
        functools.partial(_stack_kernel, B, S, nhead),
        out_shape=jax.ShapeDtypeStruct((B * S, E), jnp.float32),
        grid=(L,),
        in_specs=in_specs,
        out_specs=pl.BlockSpec((B * S, E), lambda l: (0, 0)),
        scratch_shapes=[pltpu.VMEM((B * S, E), jnp.float32)],   # resident activation
        compiler_params=pltpu.CompilerParams(
            dimension_semantics=("arbitrary",),       # layer axis is sequential
            vmem_limit_bytes=_pick_vmem_limit()),
    )(x,
      params['wqkv'], params['bqkv'], params['wo'], params['bo'],
      params['ln1w'], params['ln1b'],
      params['w1'], params['b1'], params['w2'], params['b2'],
      params['ln2w'], params['ln2b'],
      params['onw'], params['onb'])

    return jnp.transpose(out.reshape(B, S, E), (1, 0, 2))       # back to (S, B, E)


# ----------------------------------------------------------------------------
# Deterministic parameter construction (xavier-uniform matrices like the
# module's _reset_parameters; biases zero, unit LayerNorm scales).  Weights are
# stored pre-transposed (y = x @ W + b), stacked over layers, matmul weights
# in bfloat16.
# ----------------------------------------------------------------------------
def _xavier(key, shape):
    fan_out, fan_in = shape
    limit = math.sqrt(6.0 / (fan_in + fan_out))
    return jax.random.uniform(key, shape, jnp.float32, -limit, limit)


def init_params(key, d_model, nhead, num_layers, dim_feedforward):
    E, F, L = d_model, dim_feedforward, num_layers
    wqkv, wo, w1, w2 = [], [], [], []
    for _ in range(L):
        key, k1, k2, k3, k4 = jax.random.split(key, 5)
        wqkv.append(_xavier(k1, (3 * E, E)).T)            # combined in_proj -> (E, 3E)
        wo.append(_xavier(k2, (E, E)).T)                  # out_proj           -> (E, E)
        w1.append(_xavier(k3, (F, E)).T)                  # (E, F)
        w2.append(_xavier(k4, (E, F)).T)                  # (F, E)
    f32, bf16 = jnp.float32, jnp.bfloat16
    return {
        'wqkv': jnp.stack(wqkv).astype(bf16),             # (L, E, 3E)
        'bqkv': jnp.zeros((L, 1, 3 * E), f32),
        'wo':   jnp.stack(wo).astype(bf16),               # (L, E, E)
        'bo':   jnp.zeros((L, 1, E), f32),
        'ln1w': jnp.ones((L, 1, E), f32),
        'ln1b': jnp.zeros((L, 1, E), f32),
        'w1':   jnp.stack(w1).astype(bf16),               # (L, E, F)
        'b1':   jnp.zeros((L, 1, F), f32),
        'w2':   jnp.stack(w2).astype(bf16),               # (L, F, E)
        'b2':   jnp.zeros((L, 1, E), f32),
        'ln2w': jnp.ones((L, 1, E), f32),
        'ln2b': jnp.zeros((L, 1, E), f32),
        'onw':  jnp.ones((1, E), f32),
        'onb':  jnp.zeros((1, E), f32),
    }


# ----------------------------------------------------------------------------
# Pure-JAX reference (same bf16-stored weights, f32 math) for a sanity check.
# ----------------------------------------------------------------------------
def _reference_forward(x_sbe, params, nhead):
    S, B, E = x_sbe.shape
    L = params['wqkv'].shape[0]
    H, Dh = nhead, E // nhead
    x = jnp.transpose(x_sbe, (1, 0, 2)).astype(jnp.float32)      # (B,S,E)
    causal = jnp.arange(S)[None, :] <= jnp.arange(S)[:, None]

    def ln(v, w, b):
        mu = v.mean(-1, keepdims=True)
        var = ((v - mu) ** 2).mean(-1, keepdims=True)
        return (v - mu) / jnp.sqrt(var + 1e-5) * w + b

    def heads(t):
        return t.reshape(B, S, H, Dh).transpose(0, 2, 1, 3)

    for l in range(L):
        x2 = x.reshape(B * S, E)
        qkv = x2 @ params['wqkv'][l].astype(jnp.float32) + params['bqkv'][l]
        q = heads(qkv[:, :E]) / math.sqrt(Dh)
        k = heads(qkv[:, E:2 * E])
        v = heads(qkv[:, 2 * E:])
        s = jnp.einsum('bhqd,bhkd->bhqk', q, k)
        s = jnp.where(causal, s, -jnp.inf)
        p = jax.nn.softmax(s, axis=-1)
        ctx = jnp.einsum('bhqk,bhkd->bhqd', p, v).transpose(0, 2, 1, 3).reshape(B * S, E)
        attn = ctx @ params['wo'][l].astype(jnp.float32) + params['bo'][l]
        y = ln(x2 + attn, params['ln1w'][l], params['ln1b'][l])
        h1 = jnp.maximum(y @ params['w1'][l].astype(jnp.float32) + params['b1'][l], 0.0)
        h2 = h1 @ params['w2'][l].astype(jnp.float32) + params['b2'][l]
        y = ln(y + h2, params['ln2w'][l], params['ln2b'][l])
        x = y.reshape(B, S, E)
    out = ln(x.reshape(B * S, E), params['onw'], params['onb']).reshape(B, S, E)
    return jnp.transpose(out, (1, 0, 2))


# ----------------------------------------------------------------------------
if __name__ == "__main__":
    S, B = 8, 2                       # sequence length, batch
    D_MODEL, NHEAD = 32, 4
    DIM_FF, NUM_LAYERS = 64, 2

    key = jax.random.PRNGKey(0)
    key_x, key_p = jax.random.split(key)
    x = jax.random.normal(key_x, (S, B, D_MODEL), dtype=jnp.float32)
    params = init_params(key_p, D_MODEL, NHEAD, NUM_LAYERS, DIM_FF)

    out = decoder_only_transformer_forward(x, params, NHEAD)
    out = jax.block_until_ready(out)
    assert out.shape == (S, B, D_MODEL)
    assert bool(jnp.all(jnp.isfinite(out)))

    # Loose tolerance: kernel uses bf16 matmul inputs + approx reciprocal.
    ref = _reference_forward(x, params, NHEAD)
    max_err = float(jnp.max(jnp.abs(out - ref)))
    assert max_err < 0.25, f"max abs error vs reference too large: {max_err}"

    print("KERNEL_OK")
</pallas_src>

<mosaic_0001>
module attributes {stable_mosaic.version = 11 : i64} {
  func.func @_stack_kernel(%arg0: i32, %arg1: memref<16x32xf32, #tpu.memory_space<any>>, %arg2: memref<1x32x96xbf16, #tpu.memory_space<vmem>>, %arg3: memref<1x1x96xf32, #tpu.memory_space<vmem>>, %arg4: memref<1x32x32xbf16, #tpu.memory_space<vmem>>, %arg5: memref<1x1x32xf32, #tpu.memory_space<vmem>>, %arg6: memref<1x1x32xf32, #tpu.memory_space<vmem>>, %arg7: memref<1x1x32xf32, #tpu.memory_space<vmem>>, %arg8: memref<1x32x64xbf16, #tpu.memory_space<vmem>>, %arg9: memref<1x1x64xf32, #tpu.memory_space<vmem>>, %arg10: memref<1x64x32xbf16, #tpu.memory_space<vmem>>, %arg11: memref<1x1x32xf32, #tpu.memory_space<vmem>>, %arg12: memref<1x1x32xf32, #tpu.memory_space<vmem>>, %arg13: memref<1x1x32xf32, #tpu.memory_space<vmem>>, %arg14: memref<1x32xf32, #tpu.memory_space<vmem>>, %arg15: memref<1x32xf32, #tpu.memory_space<vmem>>, %arg16: memref<16x32xf32, #tpu.memory_space<vmem>>, %arg17: memref<16x32xf32, #tpu.memory_space<vmem>>) attributes {dimension_semantics = [#tpu.dimension_semantics<arbitrary>], iteration_bounds = array<i64: 2>, scalar_prefetch = 0 : i64, scratch_operands = 1 : i64, tpu.core_type = #tpu.core_type<tc>, window_params = [{}, {transform_indices = @transform_1, window_bounds = array<i64: 1, 32, 96>}, {transform_indices = @transform_2, window_bounds = array<i64: 1, 1, 96>}, {transform_indices = @transform_3, window_bounds = array<i64: 1, 32, 32>}, {transform_indices = @transform_4, window_bounds = array<i64: 1, 1, 32>}, {transform_indices = @transform_5, window_bounds = array<i64: 1, 1, 32>}, {transform_indices = @transform_6, window_bounds = array<i64: 1, 1, 32>}, {transform_indices = @transform_7, window_bounds = array<i64: 1, 32, 64>}, {transform_indices = @transform_8, window_bounds = array<i64: 1, 1, 64>}, {transform_indices = @transform_9, window_bounds = array<i64: 1, 64, 32>}, {transform_indices = @transform_10, window_bounds = array<i64: 1, 1, 32>}, {transform_indices = @transform_11, window_bounds = array<i64: 1, 1, 32>}, {transform_indices = @transform_12, window_bounds = array<i64: 1, 1, 32>}, {pipeline_mode = #tpu.pipeline_mode<synchronous>, transform_indices = @transform_13, window_bounds = array<i64: 1, 32>}, {pipeline_mode = #tpu.pipeline_mode<synchronous>, transform_indices = @transform_14, window_bounds = array<i64: 1, 32>}, {pipeline_mode = #tpu.pipeline_mode<synchronous>, transform_indices = @transform_15, window_bounds = array<i64: 16, 32>}]} {
    %c0_i32 = arith.constant 0 : i32
    %0 = arith.cmpi eq, %arg0, %c0_i32 : i32
    %1 = arith.extui %0 : i1 to i32
    %c0_i32_0 = arith.constant 0 : i32
    %2 = arith.cmpi ne, %1, %c0_i32_0 : i32
    scf.if %2 {
      "tpu.region"() ({
        %133 = tpu.sem_alloc : memref<!tpu.dma_semaphore, #tpu.memory_space<semaphore_mem>>
        tpu.enqueue_dma source(%arg1 : memref<16x32xf32, #tpu.memory_space<any>>) target(%arg17 : memref<16x32xf32, #tpu.memory_space<vmem>>) target_semaphore(%133 : memref<!tpu.dma_semaphore, #tpu.memory_space<semaphore_mem>>)
        tpu.wait_dma2 semaphore(%133 : memref<!tpu.dma_semaphore, #tpu.memory_space<semaphore_mem>>) src(%arg1 : memref<16x32xf32, #tpu.memory_space<any>>) dst(%arg17 : memref<16x32xf32, #tpu.memory_space<vmem>>)
        tpu.yield
      }) : () -> ()
    } else {
    }
    %c0 = arith.constant 0 : index
    %c0_1 = arith.constant 0 : index
    %3 = vector.load %arg17[%c0, %c0_1] : memref<16x32xf32, #tpu.memory_space<vmem>>, vector<16x32xf32>
    %4 = arith.truncf %3 : vector<16x32xf32> to vector<16x32xbf16>
    %c0_2 = arith.constant 0 : index
    %c0_3 = arith.constant 0 : index
    %c0_4 = arith.constant 0 : index
    %5 = vector.load %arg2[%c0_2, %c0_3, %c0_4] : memref<1x32x96xbf16, #tpu.memory_space<vmem>>, vector<1x32x96xbf16>
    %6 = vector.shape_cast %5 : vector<1x32x96xbf16> to vector<32x96xbf16>
    %cst = arith.constant dense<0.000000e+00> : vector<16x96xf32>
    %7 = tpu.matmul %4, %6, %cst {dimension_numbers = #tpu.dot_dimension_numbers<[1], [0], [0], [1], [0, 0, 1, 1], [], []>} : vector<16x32xbf16>, vector<32x96xbf16>, vector<16x96xf32> -> vector<16x96xf32>
    %c0_5 = arith.constant 0 : index
    %c0_6 = arith.constant 0 : index
    %c0_7 = arith.constant 0 : index
    %8 = vector.load %arg3[%c0_5, %c0_6, %c0_7] : memref<1x1x96xf32, #tpu.memory_space<vmem>>, vector<1x1x96xf32>
    %9 = vector.shape_cast %8 : vector<1x1x96xf32> to vector<1x96xf32>
    %10 = vector.broadcast %9 : vector<1x96xf32> to vector<16x96xf32>
    %11 = arith.addf %7, %10 : vector<16x96xf32>
    %12 = vector.extract_strided_slice %11 {offsets = [0, 0], sizes = [16, 32], strides = [1, 1]} : vector<16x96xf32> to vector<16x32xf32>
    %cst_8 = arith.constant 0.353553385 : f32
    %13 = vector.broadcast %cst_8 : f32 to vector<16x32xf32>
    %14 = arith.mulf %12, %13 : vector<16x32xf32>
    %15 = vector.shape_cast %14 : vector<16x32xf32> to vector<2x8x4x8xf32>
    %16 = tpu.transpose %15, [0, 2, 1, 3] : vector<2x8x4x8xf32> -> vector<2x4x8x8xf32>
    %17 = vector.shape_cast %16 : vector<2x4x8x8xf32> to vector<8x8x8xf32>
    %18 = arith.truncf %17 : vector<8x8x8xf32> to vector<8x8x8xbf16>
    %19 = vector.extract_strided_slice %11 {offsets = [0, 32], sizes = [16, 32], strides = [1, 1]} : vector<16x96xf32> to vector<16x32xf32>
    %20 = vector.shape_cast %19 : vector<16x32xf32> to vector<2x8x4x8xf32>
    %21 = tpu.transpose %20, [0, 2, 1, 3] : vector<2x8x4x8xf32> -> vector<2x4x8x8xf32>
    %22 = vector.shape_cast %21 : vector<2x4x8x8xf32> to vector<8x8x8xf32>
    %23 = arith.truncf %22 : vector<8x8x8xf32> to vector<8x8x8xbf16>
    %24 = vector.extract_strided_slice %11 {offsets = [0, 64], sizes = [16, 32], strides = [1, 1]} : vector<16x96xf32> to vector<16x32xf32>
    %25 = vector.shape_cast %24 : vector<16x32xf32> to vector<2x8x4x8xf32>
    %26 = tpu.transpose %25, [0, 2, 1, 3] : vector<2x8x4x8xf32> -> vector<2x4x8x8xf32>
    %27 = vector.shape_cast %26 : vector<2x4x8x8xf32> to vector<8x8x8xf32>
    %28 = arith.truncf %27 : vector<8x8x8xf32> to vector<8x8x8xbf16>
    %29 = tpu.iota {dimensions = array<i32: 0>} : vector<8x8xi32>
    %30 = tpu.iota {dimensions = array<i32: 1>} : vector<8x8xi32>
    %31 = arith.cmpi sle, %30, %29 : vector<8x8xi32>
    "tpu.trace_start"() <{level = 10 : i32, message = "bqd,bkd->bqk"}> : () -> ()
    %cst_9 = arith.constant dense<0.000000e+00> : vector<8x8x8xf32>
    %32 = tpu.matmul %18, %23, %cst_9 {dimension_numbers = #tpu.dot_dimension_numbers<[2], [2], [1], [1], [0, 0, 0, 1, 1, 1], [0], [0]>} : vector<8x8x8xbf16>, vector<8x8x8xbf16>, vector<8x8x8xf32> -> vector<8x8x8xf32>
    "tpu.trace_stop"() : () -> ()
    %33 = vector.shape_cast %31 : vector<8x8xi1> to vector<1x8x8xi1>
    %cst_10 = arith.constant -1.000000e+30 : f32
    %34 = vector.shape_cast %33 : vector<1x8x8xi1> to vector<1x8x8xi1>
    %35 = vector.broadcast %34 : vector<1x8x8xi1> to vector<8x8x8xi1>
    %36 = vector.broadcast %cst_10 : f32 to vector<8x8x8xf32>
    %37 = arith.select %35, %32, %36 : vector<8x8x8xi1>, vector<8x8x8xf32>
    %cst_11 = arith.constant dense<0xFF800000> : vector<8x8xf32>
    %38 = vector.multi_reduction <maximumf>, %37, %cst_11 [2] : vector<8x8x8xf32> to vector<8x8xf32>
    %39 = vector.shape_cast %38 : vector<8x8xf32> to vector<8x8x1xf32>
    %40 = vector.broadcast %39 : vector<8x8x1xf32> to vector<8x8x8xf32>
    %41 = arith.subf %37, %40 : vector<8x8x8xf32>
    %42 = math.exp %41 : vector<8x8x8xf32>
    %cst_12 = arith.constant dense<0.000000e+00> : vector<8x8xf32>
    %43 = vector.multi_reduction <add>, %42, %cst_12 [2] : vector<8x8x8xf32> to vector<8x8xf32>
    %44 = vector.shape_cast %43 : vector<8x8xf32> to vector<8x8x1xf32>
    %45 = arith.truncf %42 : vector<8x8x8xf32> to vector<8x8x8xbf16>
    "tpu.trace_start"() <{level = 10 : i32, message = "bqk,bkd->bqd"}> : () -> ()
    %cst_13 = arith.constant dense<0.000000e+00> : vector<8x8x8xf32>
    %46 = tpu.matmul %45, %28, %cst_13 {dimension_numbers = #tpu.dot_dimension_numbers<[2], [1], [1], [2], [0, 0, 0, 1, 1, 2], [0], [0]>} : vector<8x8x8xbf16>, vector<8x8x8xbf16>, vector<8x8x8xf32> -> vector<8x8x8xf32>
    "tpu.trace_stop"() : () -> ()
    %47 = tpu.reciprocal %44 {approx = true} : vector<8x8x1xf32> -> vector<8x8x1xf32>
    %48 = vector.broadcast %47 : vector<8x8x1xf32> to vector<8x8x8xf32>
    %49 = arith.mulf %46, %48 : vector<8x8x8xf32>
    %50 = vector.shape_cast %49 : vector<8x8x8xf32> to vector<2x4x8x8xf32>
    %51 = tpu.transpose %50, [0, 2, 1, 3] : vector<2x4x8x8xf32> -> vector<2x8x4x8xf32>
    %52 = vector.shape_cast %51 : vector<2x8x4x8xf32> to vector<16x32xf32>
    %53 = arith.truncf %52 : vector<16x32xf32> to vector<16x32xbf16>
    %c0_14 = arith.constant 0 : index
    %c0_15 = arith.constant 0 : index
    %c0_16 = arith.constant 0 : index
    %54 = vector.load %arg4[%c0_14, %c0_15, %c0_16] : memref<1x32x32xbf16, #tpu.memory_space<vmem>>, vector<1x32x32xbf16>
    %55 = vector.shape_cast %54 : vector<1x32x32xbf16> to vector<32x32xbf16>
    %cst_17 = arith.constant dense<0.000000e+00> : vector<16x32xf32>
    %56 = tpu.matmul %53, %55, %cst_17 {dimension_numbers = #tpu.dot_dimension_numbers<[1], [0], [0], [1], [0, 0, 1, 1], [], []>} : vector<16x32xbf16>, vector<32x32xbf16>, vector<16x32xf32> -> vector<16x32xf32>
    %c0_18 = arith.constant 0 : index
    %c0_19 = arith.constant 0 : index
    %c0_20 = arith.constant 0 : index
    %57 = vector.load %arg5[%c0_18, %c0_19, %c0_20] : memref<1x1x32xf32, #tpu.memory_space<vmem>>, vector<1x1x32xf32>
    %58 = vector.shape_cast %57 : vector<1x1x32xf32> to vector<1x32xf32>
    %59 = vector.broadcast %58 : vector<1x32xf32> to vector<16x32xf32>
    %60 = arith.addf %56, %59 : vector<16x32xf32>
    %61 = arith.addf %3, %60 : vector<16x32xf32>
    %c0_21 = arith.constant 0 : index
    %c0_22 = arith.constant 0 : index
    %c0_23 = arith.constant 0 : index
    %62 = vector.load %arg6[%c0_21, %c0_22, %c0_23] : memref<1x1x32xf32, #tpu.memory_space<vmem>>, vector<1x1x32xf32>
    %63 = vector.shape_cast %62 : vector<1x1x32xf32> to vector<1x32xf32>
    %c0_24 = arith.constant 0 : index
    %c0_25 = arith.constant 0 : index
    %c0_26 = arith.constant 0 : index
    %64 = vector.load %arg7[%c0_24, %c0_25, %c0_26] : memref<1x1x32xf32, #tpu.memory_space<vmem>>, vector<1x1x32xf32>
    %65 = vector.shape_cast %64 : vector<1x1x32xf32> to vector<1x32xf32>
    %cst_27 = arith.constant dense<0.000000e+00> : vector<16xf32>
    %66 = vector.multi_reduction <add>, %61, %cst_27 [1] : vector<16x32xf32> to vector<16xf32>
    %67 = vector.shape_cast %66 : vector<16xf32> to vector<16x1xf32>
    %cst_28 = arith.constant 3.200000e+01 : f32
    %68 = vector.broadcast %cst_28 : f32 to vector<16x1xf32>
    %69 = arith.divf %67, %68 : vector<16x1xf32>
    %70 = vector.broadcast %69 : vector<16x1xf32> to vector<16x32xf32>
    %71 = arith.subf %61, %70 : vector<16x32xf32>
    %72 = arith.mulf %71, %71 : vector<16x32xf32>
    %cst_29 = arith.constant dense<0.000000e+00> : vector<16xf32>
    %73 = vector.multi_reduction <add>, %72, %cst_29 [1] : vector<16x32xf32> to vector<16xf32>
    %74 = vector.shape_cast %73 : vector<16xf32> to vector<16x1xf32>
    %cst_30 = arith.constant 3.200000e+01 : f32
    %75 = vector.broadcast %cst_30 : f32 to vector<16x1xf32>
    %76 = arith.divf %74, %75 : vector<16x1xf32>
    %cst_31 = arith.constant 9.99999974E-6 : f32
    %77 = vector.broadcast %cst_31 : f32 to vector<16x1xf32>
    %78 = arith.addf %76, %77 : vector<16x1xf32>
    %79 = math.rsqrt %78 : vector<16x1xf32>
    %80 = vector.broadcast %79 : vector<16x1xf32> to vector<16x32xf32>
    %81 = arith.mulf %71, %80 : vector<16x32xf32>
    %82 = vector.broadcast %63 : vector<1x32xf32> to vector<16x32xf32>
    %83 = arith.mulf %81, %82 : vector<16x32xf32>
    %84 = vector.broadcast %65 : vector<1x32xf32> to vector<16x32xf32>
    %85 = arith.addf %83, %84 : vector<16x32xf32>
    %86 = arith.truncf %85 : vector<16x32xf32> to vector<16x32xbf16>
    %c0_32 = arith.constant 0 : index
    %c0_33 = arith.constant 0 : index
    %c0_34 = arith.constant 0 : index
    %87 = vector.load %arg8[%c0_32, %c0_33, %c0_34] : memref<1x32x64xbf16, #tpu.memory_space<vmem>>, vector<1x32x64xbf16>
    %88 = vector.shape_cast %87 : vector<1x32x64xbf16> to vector<32x64xbf16>
    %cst_35 = arith.constant dense<0.000000e+00> : vector<16x64xf32>
    %89 = tpu.matmul %86, %88, %cst_35 {dimension_numbers = #tpu.dot_dimension_numbers<[1], [0], [0], [1], [0, 0, 1, 1], [], []>} : vector<16x32xbf16>, vector<32x64xbf16>, vector<16x64xf32> -> vector<16x64xf32>
    %c0_36 = arith.constant 0 : index
    %c0_37 = arith.constant 0 : index
    %c0_38 = arith.constant 0 : index
    %90 = vector.load %arg9[%c0_36, %c0_37, %c0_38] : memref<1x1x64xf32, #tpu.memory_space<vmem>>, vector<1x1x64xf32>
    %91 = vector.shape_cast %90 : vector<1x1x64xf32> to vector<1x64xf32>
    %92 = vector.broadcast %91 : vector<1x64xf32> to vector<16x64xf32>
    %93 = arith.addf %89, %92 : vector<16x64xf32>
    %cst_39 = arith.constant 0.000000e+00 : f32
    %94 = vector.broadcast %cst_39 : f32 to vector<16x64xf32>
    %95 = arith.maximumf %93, %94 : vector<16x64xf32>
    %96 = arith.truncf %95 : vector<16x64xf32> to vector<16x64xbf16>
    %c0_40 = arith.constant 0 : index
    %c0_41 = arith.constant 0 : index
    %c0_42 = arith.constant 0 : index
    %97 = vector.load %arg10[%c0_40, %c0_41, %c0_42] : memref<1x64x32xbf16, #tpu.memory_space<vmem>>, vector<1x64x32xbf16>
    %98 = vector.shape_cast %97 : vector<1x64x32xbf16> to vector<64x32xbf16>
    %cst_43 = arith.constant dense<0.000000e+00> : vector<16x32xf32>
    %99 = tpu.matmul %96, %98, %cst_43 {dimension_numbers = #tpu.dot_dimension_numbers<[1], [0], [0], [1], [0, 0, 1, 1], [], []>} : vector<16x64xbf16>, vector<64x32xbf16>, vector<16x32xf32> -> vector<16x32xf32>
    %c0_44 = arith.constant 0 : index
    %c0_45 = arith.constant 0 : index
    %c0_46 = arith.constant 0 : index
    %100 = vector.load %arg11[%c0_44, %c0_45, %c0_46] : memref<1x1x32xf32, #tpu.memory_space<vmem>>, vector<1x1x32xf32>
    %101 = vector.shape_cast %100 : vector<1x1x32xf32> to vector<1x32xf32>
    %102 = vector.broadcast %101 : vector<1x32xf32> to vector<16x32xf32>
    %103 = arith.addf %99, %102 : vector<16x32xf32>
    %104 = arith.addf %85, %103 : vector<16x32xf32>
    %c0_47 = arith.constant 0 : index
    %c0_48 = arith.constant 0 : index
    %c0_49 = arith.constant 0 : index
    %105 = vector.load %arg12[%c0_47, %c0_48, %c0_49] : memref<1x1x32xf32, #tpu.memory_space<vmem>>, vector<1x1x32xf32>
    %106 = vector.shape_cast %105 : vector<1x1x32xf32> to vector<1x32xf32>
    %c0_50 = arith.constant 0 : index
    %c0_51 = arith.constant 0 : index
    %c0_52 = arith.constant 0 : index
    %107 = vector.load %arg13[%c0_50, %c0_51, %c0_52] : memref<1x1x32xf32, #tpu.memory_space<vmem>>, vector<1x1x32xf32>
    %108 = vector.shape_cast %107 : vector<1x1x32xf32> to vector<1x32xf32>
    %cst_53 = arith.constant dense<0.000000e+00> : vector<16xf32>
    %109 = vector.multi_reduction <add>, %104, %cst_53 [1] : vector<16x32xf32> to vector<16xf32>
    %110 = vector.shape_cast %109 : vector<16xf32> to vector<16x1xf32>
    %cst_54 = arith.constant 3.200000e+01 : f32
    %111 = vector.broadcast %cst_54 : f32 to vector<16x1xf32>
    %112 = arith.divf %110, %111 : vector<16x1xf32>
    %113 = vector.broadcast %112 : vector<16x1xf32> to vector<16x32xf32>
    %114 = arith.subf %104, %113 : vector<16x32xf32>
    %115 = arith.mulf %114, %114 : vector<16x32xf32>
    %cst_55 = arith.constant dense<0.000000e+00> : vector<16xf32>
    %116 = vector.multi_reduction <add>, %115, %cst_55 [1] : vector<16x32xf32> to vector<16xf32>
    %117 = vector.shape_cast %116 : vector<16xf32> to vector<16x1xf32>
    %cst_56 = arith.constant 3.200000e+01 : f32
    %118 = vector.broadcast %cst_56 : f32 to vector<16x1xf32>
    %119 = arith.divf %117, %118 : vector<16x1xf32>
    %cst_57 = arith.constant 9.99999974E-6 : f32
    %120 = vector.broadcast %cst_57 : f32 to vector<16x1xf32>
    %121 = arith.addf %119, %120 : vector<16x1xf32>
    %122 = math.rsqrt %121 : vector<16x1xf32>
    %123 = vector.broadcast %122 : vector<16x1xf32> to vector<16x32xf32>
    %124 = arith.mulf %114, %123 : vector<16x32xf32>
    %125 = vector.broadcast %106 : vector<1x32xf32> to vector<16x32xf32>
    %126 = arith.mulf %124, %125 : vector<16x32xf32>
    %127 = vector.broadcast %108 : vector<1x32xf32> to vector<16x32xf32>
    %128 = arith.addf %126, %127 : vector<16x32xf32>
    %c0_58 = arith.constant 0 : index
    %c0_59 = arith.constant 0 : index
    %129 = vector.load %arg17[%c0_58, %c0_59] : memref<16x32xf32, #tpu.memory_space<vmem>>, vector<16x32xf32>
    tpu.vector_store %arg17[%c0_58, %c0_59], %128 {strides = array<i32>} : memref<16x32xf32, #tpu.memory_space<vmem>>, vector<16x32xf32>,
    %c1_i32 = arith.constant 1 : i32
    %130 = arith.cmpi eq, %arg0, %c1_i32 : i32
    %131 = arith.extui %130 : i1 to i32
    %c0_i32_60 = arith.constant 0 : i32
    %132 = arith.cmpi ne, %131, %c0_i32_60 : i32
    scf.if %132 {
      %c0_61 = arith.constant 0 : index
      %c0_62 = arith.constant 0 : index
      %133 = vector.load %arg14[%c0_61, %c0_62] : memref<1x32xf32, #tpu.memory_space<vmem>>, vector<1x32xf32>
      %c0_63 = arith.constant 0 : index
      %c0_64 = arith.constant 0 : index
      %134 = vector.load %arg15[%c0_63, %c0_64] : memref<1x32xf32, #tpu.memory_space<vmem>>, vector<1x32xf32>
      %cst_65 = arith.constant dense<0.000000e+00> : vector<16xf32>
      %135 = vector.multi_reduction <add>, %128, %cst_65 [1] : vector<16x32xf32> to vector<16xf32>
      %136 = vector.shape_cast %135 : vector<16xf32> to vector<16x1xf32>
      %cst_66 = arith.constant 3.200000e+01 : f32
      %137 = vector.broadcast %cst_66 : f32 to vector<16x1xf32>
      %138 = arith.divf %136, %137 : vector<16x1xf32>
      %139 = vector.broadcast %138 : vector<16x1xf32> to vector<16x32xf32>
      %140 = arith.subf %128, %139 : vector<16x32xf32>
      %141 = arith.mulf %140, %140 : vector<16x32xf32>
      %cst_67 = arith.constant dense<0.000000e+00> : vector<16xf32>
      %142 = vector.multi_reduction <add>, %141, %cst_67 [1] : vector<16x32xf32> to vector<16xf32>
      %143 = vector.shape_cast %142 : vector<16xf32> to vector<16x1xf32>
      %cst_68 = arith.constant 3.200000e+01 : f32
      %144 = vector.broadcast %cst_68 : f32 to vector<16x1xf32>
      %145 = arith.divf %143, %144 : vector<16x1xf32>
      %cst_69 = arith.constant 9.99999974E-6 : f32
      %146 = vector.broadcast %cst_69 : f32 to vector<16x1xf32>
      %147 = arith.addf %145, %146 : vector<16x1xf32>
      %148 = math.rsqrt %147 : vector<16x1xf32>
      %149 = vector.broadcast %148 : vector<16x1xf32> to vector<16x32xf32>
      %150 = arith.mulf %140, %149 : vector<16x32xf32>
      %151 = vector.broadcast %133 : vector<1x32xf32> to vector<16x32xf32>
      %152 = arith.mulf %150, %151 : vector<16x32xf32>
      %153 = vector.broadcast %134 : vector<1x32xf32> to vector<16x32xf32>
      %154 = arith.addf %152, %153 : vector<16x32xf32>
      %c0_70 = arith.constant 0 : index
      %c0_71 = arith.constant 0 : index
      %155 = vector.load %arg16[%c0_70, %c0_71] : memref<16x32xf32, #tpu.memory_space<vmem>>, vector<16x32xf32>
      tpu.vector_store %arg16[%c0_70, %c0_71], %154 {strides = array<i32>} : memref<16x32xf32, #tpu.memory_space<vmem>>, vector<16x32xf32>,
    } else {
    }
    return
  }
  func.func @transform_1(%arg0: i32) -> (i32, i32, i32) {
    %c0_i32 = arith.constant 0 : i32
    %c0_i32_0 = arith.constant 0 : i32
    %c0_i32_1 = arith.constant 0 : i32
    return %arg0, %c0_i32, %c0_i32_0 : i32, i32, i32
  }
  func.func @transform_2(%arg0: i32) -> (i32, i32, i32) {
    %c0_i32 = arith.constant 0 : i32
    %c0_i32_0 = arith.constant 0 : i32
    %c0_i32_1 = arith.constant 0 : i32
    return %arg0, %c0_i32, %c0_i32_0 : i32, i32, i32
  }
  func.func @transform_3(%arg0: i32) -> (i32, i32, i32) {
    %c0_i32 = arith.constant 0 : i32
    %c0_i32_0 = arith.constant 0 : i32
    %c0_i32_1 = arith.constant 0 : i32
    return %arg0, %c0_i32, %c0_i32_0 : i32, i32, i32
  }
  func.func @transform_4(%arg0: i32) -> (i32, i32, i32) {
    %c0_i32 = arith.constant 0 : i32
    %c0_i32_0 = arith.constant 0 : i32
    %c0_i32_1 = arith.constant 0 : i32
    return %arg0, %c0_i32, %c0_i32_0 : i32, i32, i32
  }
  func.func @transform_5(%arg0: i32) -> (i32, i32, i32) {
    %c0_i32 = arith.constant 0 : i32
    %c0_i32_0 = arith.constant 0 : i32
    %c0_i32_1 = arith.constant 0 : i32
    return %arg0, %c0_i32, %c0_i32_0 : i32, i32, i32
  }
  func.func @transform_6(%arg0: i32) -> (i32, i32, i32) {
    %c0_i32 = arith.constant 0 : i32
    %c0_i32_0 = arith.constant 0 : i32
    %c0_i32_1 = arith.constant 0 : i32
    return %arg0, %c0_i32, %c0_i32_0 : i32, i32, i32
  }
  func.func @transform_7(%arg0: i32) -> (i32, i32, i32) {
    %c0_i32 = arith.constant 0 : i32
    %c0_i32_0 = arith.constant 0 : i32
    %c0_i32_1 = arith.constant 0 : i32
    return %arg0, %c0_i32, %c0_i32_0 : i32, i32, i32
  }
  func.func @transform_8(%arg0: i32) -> (i32, i32, i32) {
    %c0_i32 = arith.constant 0 : i32
    %c0_i32_0 = arith.constant 0 : i32
    %c0_i32_1 = arith.constant 0 : i32
    return %arg0, %c0_i32, %c0_i32_0 : i32, i32, i32
  }
  func.func @transform_9(%arg0: i32) -> (i32, i32, i32) {
    %c0_i32 = arith.constant 0 : i32
    %c0_i32_0 = arith.constant 0 : i32
    %c0_i32_1 = arith.constant 0 : i32
    return %arg0, %c0_i32, %c0_i32_0 : i32, i32, i32
  }
  func.func @transform_10(%arg0: i32) -> (i32, i32, i32) {
    %c0_i32 = arith.constant 0 : i32
    %c0_i32_0 = arith.constant 0 : i32
    %c0_i32_1 = arith.constant 0 : i32
    return %arg0, %c0_i32, %c0_i32_0 : i32, i32, i32
  }
  func.func @transform_11(%arg0: i32) -> (i32, i32, i32) {
    %c0_i32 = arith.constant 0 : i32
    %c0_i32_0 = arith.constant 0 : i32
    %c0_i32_1 = arith.constant 0 : i32
    return %arg0, %c0_i32, %c0_i32_0 : i32, i32, i32
  }
  func.func @transform_12(%arg0: i32) -> (i32, i32, i32) {
    %c0_i32 = arith.constant 0 : i32
    %c0_i32_0 = arith.constant 0 : i32
    %c0_i32_1 = arith.constant 0 : i32
    return %arg0, %c0_i32, %c0_i32_0 : i32, i32, i32
  }
  func.func @transform_13(%arg0: i32) -> (i32, i32) {
    %c0_i32 = arith.constant 0 : i32
    %c0_i32_0 = arith.constant 0 : i32
    %c0_i32_1 = arith.constant 0 : i32
    return %c0_i32, %c0_i32_0 : i32, i32
  }
  func.func @transform_14(%arg0: i32) -> (i32, i32) {
    %c0_i32 = arith.constant 0 : i32
    %c0_i32_0 = arith.constant 0 : i32
    %c0_i32_1 = arith.constant 0 : i32
    return %c0_i32, %c0_i32_0 : i32, i32
  }
  func.func @transform_15(%arg0: i32) -> (i32, i32) {
    %c0_i32 = arith.constant 0 : i32
    %c0_i32_0 = arith.constant 0 : i32
    %c0_i32_1 = arith.constant 0 : i32
    return %c0_i32, %c0_i32_0 : i32, i32
  }
}

</mosaic_0001>

<bundles_post_ra>
// kernel: tpu_custom_call.1
= control target key start
LH: loop header
LB: loop body
LE: loop exit
PB: predicated region body
PF: predicated region fallthrough
CT: control target
= control target key end

     0   :  { %s4926_s0 = inlined_call_operand.hbm [shape: f32[16,32], index: 0, kind: input, shape index: {}]   ;;  %s4927_s1 = inlined_call_operand.vmem [shape: bf16[2,32,96], index: 1, kind: input, shape index: {}]   ;;  %s4928_s2 = inlined_call_operand.vmem [shape: f32[2,1,96], index: 2, kind: input, shape index: {}]   ;;  %s4929_s3 = inlined_call_operand.vmem [shape: bf16[2,32,32], index: 3, kind: input, shape index: {}]   ;;  %s4930_s4 = inlined_call_operand.hbm [shape: f32[2,1,32], index: 4, kind: input, shape index: {}]   ;;  %s4931_s5 = inlined_call_operand.hbm [shape: f32[2,1,32], index: 5, kind: input, shape index: {}]   ;;  %s4932_s6 = inlined_call_operand.hbm [shape: f32[2,1,32], index: 6, kind: input, shape index: {}]   ;;  %s4933_s7 = inlined_call_operand.vmem [shape: bf16[2,32,64], index: 7, kind: input, shape index: {}]   ;;  %s4934_s8 = inlined_call_operand.hbm [shape: f32[2,1,64], index: 8, kind: input, shape index: {}]   ;;  %s4935_s9 = inlined_call_operand.vmem [shape: bf16[2,64,32], index: 9, kind: input, shape index: {}]   ;;  %s4936_s10 = inlined_call_operand.vmem [shape: f32[2,1,32], index: 10, kind: input, shape index: {}]   ;;  %s4937_s11 = inlined_call_operand.vmem [shape: f32[2,1,32], index: 11, kind: input, shape index: {}]   ;;  %s4938_s12 = inlined_call_operand.vmem [shape: f32[2,1,32], index: 12, kind: input, shape index: {}]   ;;  %s4939_s13 = inlined_call_operand.vmem [shape: f32[1,32], index: 13, kind: input, shape index: {}]   ;;  %s4940_s14 = inlined_call_operand.vmem [shape: f32[1,32], index: 14, kind: input, shape index: {}]   ;;  %s4941_s15 = inlined_call_operand.hbm [shape: f32[16,32], index: 15, kind: output, shape index: {}]  }
   0x1   :  { %4950 = sst [smem:[#allocation25_spill]] %s4926_s0 }
   0x2   :  { %4951 = sst [smem:[#allocation26_spill]] %s4927_s1 }
   0x3   :  { %4952 = sst [smem:[#allocation27_spill]] %s4929_s3 }
   0x4   :  { %4953 = sst [smem:[#allocation28_spill]] %s4930_s4 }
   0x5   :  { %4954 = sst [smem:[#allocation29_spill]] %s4931_s5 }
   0x6   :  { %4955 = sst [smem:[#allocation30_spill]] %s4938_s12 }
   0x7   :  { %4956 = sst [smem:[#allocation31_spill]] %s4939_s13 }
   0x8   :  { %4957 = sst [smem:[#allocation32_spill]] %s4940_s14 }
   0x9   :  { %4958 = sst [smem:[#allocation33_spill]] %s4941_s15 }
   0xa   :  { %20 = vsyncpa [#allocation4], 0 }
   0xb   :  { %22 = vsyncpa [#allocation4 + $0x1], 0 }
   0xc   :  { %23 = vsyncpa [#allocation7], 0 }
   0xd   :  { %25 = vsyncpa [#allocation7 + $0x1], 0 }
   0xe   :  { %26 = vsyncpa [#allocation10], 0 }
   0xf   :  { %28 = vsyncpa [#allocation10 + $0x1], 0 }
  0x10   :  { %29 = vsyncpa [#allocation5], 0  ;;  %s4159_s18 = smov 0   ;;  %s4161_s19 = smov 0  }
  0x11   :  { %s4163_s20 = smov 0   ;;  %s4165_s21 = smov 0  }
  0x12 LB: > { %4959 = sst [smem:[#allocation22_spill]] %s4054_s20  ;;  %s4178_s22 = sadd.s32 4294967295, %s4058_s21   ;;  %s4058_s21 = sphi %s4165_s21, %s4989_s21   ;;  %s4054_s20 = sphi %s4163_s20, %s4991_s20   ;;  %s4050_s19 = sphi %s4161_s19, %s4993_s19   ;;  %s4046_s18 = sphi %s4159_s18, %s4992_s18  }
  0x13   : > { %s4181_s23 = sadd.s32 1, %s4058_s21   ;;  %s120_s25 = sadd.s32 1, %s4054_s20 }
  0x14   : > { %4960 = sst [smem:[#allocation23_spill]] %s4181_s23  ;;  %s117_s24 = ssub.s32 %s4058_s21, %s4181_s23 }
  0x15   : > { %p118_p0 = scmp.eq.s32.totalorder %s117_s24, 0  ;;  %p127_p1 = scmp.ne.s32.totalorder %s4054_s20, %s4050_s19 }
  0x16   : > { %p128_p2 = scmp.eq.s32.totalorder %s4058_s21, 0  ;;  %p133_p3 = scmp.ne.s32.totalorder %s4050_s19, %s4046_s18 }
  0x17   : > { %s4191_s26 = scalar_select %p118_p0, %s4054_s20, %s120_s25  }
  0x18   : > { %p129_p4 = por %p128_p2, %p127_p1  ;;  %p134_p5 = scmp.eq.s32.totalorder %s4178_s22, 0 }
  0x19   : > { %4961 = sst [smem:[#allocation24_spill]] %s4191_s26  ;;  %p3721_p6 = scmp.lt.s32.totalorder %s4058_s21, 2 }
  0x1a   : > { %p4195_p7 = por %p134_p5, %p133_p3  ;;  %s4200_s28 = sand.u32 1, %s4054_s20  }
  0x1b   : > { %s4203_s29 = sshll.u32 %s4058_s21, 4  ;;  %p4205_p8 = pnand %p3721_p6, %p129_p4 }
  0x1c   : > { %s4962_s27 = scalar_select %p4195_p7, 1, 0 }
  0x1d   : > { %s4963_s30 = scalar_select %p4205_p8, 1, 0 }
  0x1e   : > { %s473_s16 = sand.u32 1, %s4058_s21   ;;  %s4964_s5 = sld [smem:[#allocation29_spill]] }
  0x1f   : > { %s476_s25 = scalar_lea.vmem [#allocation6], %s4200_s28  ;;  %s4220_s20 = scalar_lea.sflag [#allocation7], %s473_s16 }
  0x20   : > { %s483_s26 = sshll.u32 %s476_s25, 4  ;;  %p4226_p11 = pneg %p4205_p8  ;;  %s4217_s26 = int_to_ptr.vmem [resolvable:$true] %s483_s26 }
  0x24   : > { %s4214_s24 = scalar_lea.hbm %s4964_s5, %s4203_s29  ;;  %s3847_s25 = scalar_lea.hbm %s4964_s5, 32 }
  0x25   : > { %s3842_s23 = scalar_lea.hbm %s4214_s24, 16  ;;  %p3848_p0 = scmp.lt.u32.totalorder %s4214_s24, %s4964_s5 }
  0x26   : > { %p3843_p10 = scmp.ne.s32.totalorder %s4214_s24, %s3842_s23  ;;  %p3849_p1 = scmp.lt.u32.totalorder %s3847_s25, %s3842_s23 }
  0x27   : > { %p3851_p3 = scmp.lt.u32.totalorder %s3842_s23, %s4214_s24 }
  0x28   : > { %p3845_p12 = pnand %p4226_p11, %p3843_p10  ;;  %p3850_p2 = por %p3849_p1, %p3848_p0 }
  0x2a   : > { %p3846_p13 = pneg %p3845_p12  ;;  %p3852_p4 = por %p3851_p3, %p3850_p2 }
  0x2c   : > { %p3853_p5 = pnand %p3852_p4, %p3846_p13 }
  0x2e   : > { %3856 = shalt.err (!%p3853_p5)
}
  0x2f   : > { %s3857_s16 = scalar_lea.vmem %s4217_s26, 16  ;;  %s4060_s17 = smov [#allocation6]  }
  0x30   : > { %p3858_p6 = scmp.ne.s32.totalorder %s4217_s26, %s3857_s16  ;;  %s3862_s18 = sshll.u32 %s4060_s17, 4  ;;  %s3863_s18 = int_to_ptr.vmem [resolvable:$false] %s3862_s18 }
  0x31   : > { %s3864_s13 = scalar_lea.vmem %s3863_s18, 32  ;;  %p3865_p9 = scmp.lt.s32.totalorder %s4217_s26, %s3863_s18 }
  0x32   : > { %p3860_p10 = pnand %p3858_p6, %p4226_p11  ;;  %p3866_p7 = scmp.lt.s32.totalorder %s3864_s13, %s3857_s16 }
  0x34   : > { %p3861_p12 = pneg %p3860_p10  ;;  %p3867_p0 = por %p3866_p7, %p3865_p9 }
  0x36   : > { %p3868_p1 = pnand %p3867_p0, %p3861_p12 }
  0x38   : > { %3871 = shalt.err (!%p3868_p1)
}
  0x39   : > { %3714 = dma.hbm_to_vmem [thread:$0]  (!%p4205_p8), %s4214_s24, 16, %s4217_s26, %s4220_s20  }
  0x3a   : > { %p556_p13 = scmp.lt.s32.totalorder %s4058_s21, 3  ;;  %s4966_s4 = sld [smem:[#allocation28_spill]] }
  0x3b   : > { %p4967_p7 = scmp.ge.s32.totalorder %s4058_s21, 1  ;;  %s459_s17 = scalar_lea.vmem [#allocation3], %s4200_s28 }
  0x3c   : > { %s466_s18 = sshll.u32 %s459_s17, 4  ;;  %s457_s13 = scalar_lea.sflag [#allocation4], %s4200_s28  ;;  %s467_s18 = int_to_ptr.vmem [resolvable:$true] %s466_s18 }
  0x3d   : > { %p4259_p9 = pnand %p4967_p7, %p556_p13 }
  0x3f   : > { %s4968_s16 = scalar_select %p4259_p9, 1, 0 }
  0x40   : > { %s4255_s25 = scalar_lea.hbm %s4966_s4, %s4203_s29  ;;  %s3877_s21 = scalar_lea.hbm %s4966_s4, 32 }
  0x41   : > { %s3872_s26 = scalar_lea.hbm %s4255_s25, 16  ;;  %p3878_p5 = scmp.lt.u32.totalorder %s4255_s25, %s4966_s4 }
  0x42   : > { %p3873_p2 = scmp.ne.s32.totalorder %s4255_s25, %s3872_s26  ;;  %p3879_p6 = scmp.lt.u32.totalorder %s3877_s21, %s3872_s26 }
  0x43   : > { %p3881_p12 = scmp.lt.u32.totalorder %s3872_s26, %s4255_s25 }
  0x44   : > { %p3875_p3 = pnand %p3873_p2, %p4226_p11  ;;  %p3880_p10 = por %p3879_p6, %p3878_p5 }
  0x46   : > { %p3876_p4 = pneg %p3875_p3  ;;  %p3882_p0 = por %p3881_p12, %p3880_p10 }
  0x48   : > { %p3883_p1 = pnand %p3882_p0, %p3876_p4 }
  0x4a   : > { %3886 = shalt.err (!%p3883_p1)
}
  0x4b   : > { %s3887_s17 = scalar_lea.vmem %s467_s18, 16  ;;  %s4061_s0 = smov [#allocation3]  }
  0x4c   : > { %p3888_p13 = scmp.ne.s32.totalorder %s467_s18, %s3887_s17  ;;  %s3892_s12 = sshll.u32 %s4061_s0, 4  ;;  %s3893_s12 = int_to_ptr.vmem [resolvable:$false] %s3892_s12 }
  0x4d   : > { %s3894_s24 = scalar_lea.vmem %s3893_s12, 32  ;;  %p3895_p3 = scmp.lt.s32.totalorder %s467_s18, %s3893_s12 }
  0x4e   : > { %p3890_p7 = pnand %p3888_p13, %p4226_p11  ;;  %p3896_p9 = scmp.lt.s32.totalorder %s3894_s24, %s3887_s17 }
  0x50   : > { %p3891_p2 = pneg %p3890_p7  ;;  %p3897_p8 = por %p3896_p9, %p3895_p3 }
  0x52   : > { %p3898_p5 = pnand %p3897_p8, %p3891_p2 }
  0x54   : > { %3901 = shalt.err (!%p3898_p5)
}
  0x55   : > { %p4969_p6 = scmp.ne.s32.totalorder %s4963_s30, 0  ;;  %s4286_s14 = scalar_lea.hbm %s4932_s6, %s4203_s29 }
  0x56   : > { %s493_s0 = scalar_lea.vmem [#allocation8], %s4200_s28  ;;  %s3902_s21 = scalar_lea.hbm %s4286_s14, 16 }
  0x57   : > { %3711 = dma.hbm_to_vmem [thread:$0]  (!%p4969_p6), %s4255_s25, 16, %s467_s18, %s457_s13  }
  0x58   : > { %s500_s12 = sshll.u32 %s493_s0, 4  ;;  %p3903_p8 = scmp.ne.s32.totalorder %s4286_s14, %s3902_s21  ;;  %s501_s12 = int_to_ptr.vmem [resolvable:$true] %s500_s12 }
  0x59   : > { %s3907_s25 = scalar_lea.hbm %s4932_s6, 32  ;;  %p3908_p10 = scmp.lt.u32.totalorder %s4286_s14, %s4932_s6 }
  0x5a   : > { %p3905_p9 = pnand %p3903_p8, %p4226_p11  ;;  %p3909_p12 = scmp.lt.u32.totalorder %s3907_s25, %s3902_s21 }
  0x5b   : > { %p3911_p1 = scmp.lt.u32.totalorder %s3902_s21, %s4286_s14 }
  0x5c   : > { %p3906_p4 = pneg %p3905_p9  ;;  %p3910_p0 = por %p3909_p12, %p3908_p10 }
  0x5e   : > { %p3912_p13 = por %p3911_p1, %p3910_p0 }
  0x60   : > { %p3913_p7 = pnand %p3912_p13, %p3906_p4 }
  0x62   : > { %3916 = shalt.err (!%p3913_p7)
}
  0x63   : > { %s3917_s24 = scalar_lea.vmem %s501_s12, 16  ;;  %s4062_s5 = smov [#allocation8]  }
  0x64   : > { %p3918_p2 = scmp.ne.s32.totalorder %s501_s12, %s3917_s24  ;;  %s3922_s26 = sshll.u32 %s4062_s5, 4  ;;  %s3923_s26 = int_to_ptr.vmem [resolvable:$false] %s3922_s26 }
  0x65   : > { %s3924_s0 = scalar_lea.vmem %s3923_s26, 32  ;;  %p3925_p8 = scmp.lt.s32.totalorder %s501_s12, %s3923_s26 }
  0x66   : > { %p3920_p3 = pnand %p3918_p2, %p4226_p11  ;;  %p3926_p9 = scmp.lt.s32.totalorder %s3924_s0, %s3917_s24 }
  0x68   : > { %p3921_p5 = pneg %p3920_p3  ;;  %p3927_p6 = por %p3926_p9, %p3925_p8 }
  0x6a   : > { %p3928_p10 = pnand %p3927_p6, %p3921_p5 }
  0x6c   : > { %3931 = shalt.err (!%p3928_p10)
}
  0x6d   : > { %p4970_p12 = scmp.ne.s32.totalorder %s4963_s30, 0  ;;  %s4311_s17 = scalar_lea.hbm %s4934_s8, %s4203_s29 }
  0x6e   : > { %s518_s25 = scalar_lea.vmem [#allocation9], %s4200_s28  ;;  %s516_s13 = scalar_lea.sflag [#allocation10], %s4200_s28 }
  0x6f   : > { %3717 = dma.hbm_to_vmem [thread:$0]  (!%p4970_p12), %s4286_s14, 16, %s501_s12, %s4220_s20  }
  0x70   : > { %s525_s18 = sshll.u32 %s518_s25, 4  ;;  %s3932_s24 = scalar_lea.hbm %s4311_s17, 16  ;;  %s526_s18 = int_to_ptr.vmem [resolvable:$true] %s525_s18 }
  0x71   : > { %p3933_p6 = scmp.ne.s32.totalorder %s4311_s17, %s3932_s24  ;;  %s3937_s14 = scalar_lea.hbm %s4934_s8, 32 }
  0x72   : > { %p3938_p1 = scmp.lt.u32.totalorder %s4311_s17, %s4934_s8  ;;  %p3939_p13 = scmp.lt.u32.totalorder %s3937_s14, %s3932_s24 }
  0x73   : > { %p3935_p4 = pnand %p3933_p6, %p4226_p11  ;;  %p3941_p2 = scmp.lt.u32.totalorder %s3932_s24, %s4311_s17 }
  0x74   : > { %p3940_p7 = por %p3939_p13, %p3938_p1 }
  0x75   : > { %p3936_p0 = pneg %p3935_p4 }
  0x76   : > { %p3942_p3 = por %p3941_p2, %p3940_p7 }
  0x78   : > { %p3943_p5 = pnand %p3942_p3, %p3936_p0 }
  0x7a   : > { %3946 = shalt.err (!%p3943_p5)
}
  0x7b   : > { %s3947_s28 = scalar_lea.vmem %s526_s18, 16  ;;  %s4063_s26 = smov [#allocation9]  }
  0x7c   : > { %p3948_p8 = scmp.ne.s32.totalorder %s526_s18, %s3947_s28  ;;  %s3952_s0 = sshll.u32 %s4063_s26, 4  ;;  %s3953_s0 = int_to_ptr.vmem [resolvable:$false] %s3952_s0 }
  0x7d   : > { %s3954_s21 = scalar_lea.vmem %s3953_s0, 32  ;;  %p3955_p6 = scmp.lt.s32.totalorder %s526_s18, %s3953_s0 }
  0x7e   : > { %p3950_p9 = pnand %p3948_p8, %p4226_p11  ;;  %p3956_p4 = scmp.lt.s32.totalorder %s3954_s21, %s3947_s28 }
  0x80   : > { %p3951_p10 = pneg %p3950_p9  ;;  %p3957_p12 = por %p3956_p4, %p3955_p6 }
  0x82   : > { %p3958_p1 = pnand %p3957_p12, %p3951_p10 }
  0x84   : > { %3961 = shalt.err (!%p3958_p1)
}
  0x85   : > { %p4971_p13 = scmp.ne.s32.totalorder %s4963_s30, 0  ;;  %p4972_p0 = scmp.ne.s32.totalorder %s4968_s16, 0 }
  0x86   : > { %s4335_s15 = sand.u32 (!%p4972_p0), 1, %s4050_s19   ;;  %p4973_p11 = scmp.ne.s32.totalorder (!%p4972_p0), %s4962_s27, 0 }
  0x87   : > { %3720 = dma.hbm_to_vmem [thread:$0]  (!%p4971_p13), %s4311_s17, 16, %s526_s18, %s516_s13  }
  0x88   : > { %560 = sbr.rel (%p4972_p0) target bundleno = 3124 (0xc34), region = 76  ;;  %s563_s23 = scalar_lea.sflag (!%p4972_p0), [#allocation4], %s4335_s15 }
  0x8f   : > { %4027 = dma.done.wait (%p4973_p11), %s563_s23, 16  }
  0x90   : > { %4029 = vsyncadd (%p4973_p11), %s563_s23, 4294967280  ;;  %s570_s30 = sand.u32 1, %s4178_s22  }
  0x91   : > { %s571_s17 = scalar_lea.sflag [#allocation7], %s570_s30 }
  0x92   : > { %4031 = dma.done.wait (%p4973_p11), %s571_s17, 32  }
  0x93   : > { %4033 = vsyncadd (%p4973_p11), %s571_s17, 4294967264  ;;  %s587_s13 = scalar_lea.sflag [#allocation10], %s4335_s15 }
  0x94   : > { %4035 = dma.done.wait (%p4973_p11), %s587_s13, 16  }
  0x95   : > { %4037 = vsyncadd (%p4973_p11), %s587_s13, 4294967280  ;;  %p672_p12 = scmp.lt.s32.totalorder %s4178_s22, 1  ;;  %s4974_s1 = sld [smem:[#allocation26_spill]] }
  0x96   : > { %s4975_s3 = sld [smem:[#allocation27_spill]]  ;;  %p3452_p7 = scmp.ne.s32.totalorder %s4178_s22, 0 }
  0x97   : > { %s4358_s5 = scalar_select %p672_p12, %s4178_s22, 1 }
  0x99   : > { %s3514_s20 = sshll.u32 %s4358_s5, 4  ;;  %s3517_s24 = sshll.u32 %s4358_s5, 5 }
  0x9a   : > { %s4378_s13 = scalar_lea.vmem %s4933_s7, %s3514_s20  ;;  %s4384_s14 = scalar_lea.vmem %s4935_s9, %s3517_s24 }
  0x9b   : > { %s4368_s27 = scalar_lea.vmem %s4974_s1, %s3514_s20  ;;  %s697_s26 = scalar_lea.vmem %s4936_s10, %s4358_s5 }
  0x9c   : > { %s4373_s23 = scalar_lea.vmem %s4975_s3, %s3514_s20  ;;  %s700_s0 = scalar_lea.vmem %s4937_s11, %s4358_s5 }
  0x9d   : > { %s4976_s3 = sld [smem:[#allocation30_spill]]  ;;  %708 = sbr.rel (%p3452_p7) target bundleno = 187 (0xbb), region = 96 }
  0xa3   : > { %s703_s30 = scalar_lea.vmem %s4976_s3, %s4358_s5 }
  0xa4   : > { %s4064_s20 = smov [#allocation2]   ;;  %s4977_s24 = sld [smem:[#allocation25_spill]] }
  0xa5   : > { %s716_s17 = sshll.u32 %s4064_s20, 4  ;;  %s717_s17 = int_to_ptr.vmem [resolvable:$true] %s716_s17 }
  0xaa   : > { %s3962_s4 = scalar_lea.hbm %s4977_s24, 256 }
  0xab   : > { %p3963_p2 = scmp.ne.s32.totalorder %s4977_s24, %s3962_s4  ;;  %p3966_p3 = scmp.lt.u32.totalorder %s3962_s4, %s4977_s24 }
  0xad   : > { %p3968_p5 = pnand %p3966_p3, %p3963_p2 }
  0xaf   : > { %3971 = shalt.err (!%p3968_p5)  }
  0xb0   : > { %s3972_s1 = scalar_lea.vmem %s717_s17, 256  ;;  %p3977_p9 = scmp.lt.s32.totalorder %s717_s17, %s717_s17 }
  0xb1   : > { %p3973_p8 = scmp.ne.s32.totalorder %s717_s17, %s3972_s1  ;;  %p3978_p10 = scmp.lt.s32.totalorder %s3972_s1, %s3972_s1 }
  0xb3   : > { %p3979_p6 = por %p3978_p10, %p3977_p9 }
  0xb5   : > { %p3980_p4 = pnand %p3979_p6, %p3973_p8 }
  0xb7   : > { %3983 = shalt.err (!%p3980_p4)  }
  0xb8   : > { %719 = dma.hbm_to_vmem [thread:$0]  %s4977_s24, 256, %s717_s17, [#allocation12] }
  0xb9   : > { %4038 = dma.done.wait [#allocation12], 256 }
  0xba   : > { %4039 = vsyncadd [#allocation12], 4294967040 }
  0xbb PF: > { %v3786_v0 = vld [vmem:[%s4368_s27] sm:$0xff]   ;;  %v4065_v1 = vmov 0.0   ;;  %v3787_v2 = vld [vmem:[%s4368_s27 + $0x8] sm:$0xff]   ;;  %vm4066_vm0 = vmmov 0   ;;  %vm749_vm1 = vcmask 261120   ;;  %s4978_s20 = scalar_lea.vmem %s4928_s2, %s4358_s5  ;;  %s4067_s17 = smov 104   ;;  %v821_v23 = vlaneseq }
  0xbc   : > { %3564 = vmatprep.subr.bf16.mxu0 %v4065_v1  ;;  %3572 = vmatprep.subr.bf16.mxu1 %v4065_v1  ;;  %v723_v3 = vld [vmem:[#allocation2] sm:$0xff]  ;;  %v724_v4 = vld [vmem:[#allocation2 + $0x8] sm:$0xff]  ;;  %s4068_s16 = smov 120   ;;  %s4069_s18 = smov 112   ;;  %v4072_v21 = vmov 1983009808  }
  0xbd   : > { %3565 = vmatpush3.bf16.msra.mxu0 %v3786_v0  ;;  %3568 = vmatprep.mubr.msk.bf16.mxu0 %vm4066_vm0, %v4065_v1  ;;  %v725_v5 = vpack.c.bf16 %v724_v4, %v723_v3  ;;  %v3453_v6 = vld [vmem:[%s4978_s20] ss:$0 sm:$0xff]  ;;  %s4070_s12 = smov 96   ;;  %s4071_s28 = smov 64   ;;  %v819_v22 = vunpack.c.l.s4 %v4072_v21  ;;  %v4073_v24 = vmov 1934713408  }
  0xbe   : > { %3566 = vmatprep.subr.bf16.mxu0 %v4065_v1  ;;  %3574 = vmatprep.mubr.msk.bf16.mxu1 %vm4066_vm0, %v4065_v1  ;;  %v851_v25 = vunpack.c.l.s4 %v4073_v24  ;;  %v4458_v27 = vshrl.u32 %v821_v23, 7  ;;  %vm1723_vm2 = vcmask 64512   ;;  %vm2185_vm3 = vcmask 1043456   ;;  %s4075_s25 = smov 8   ;;  %s4076_s29 = smov 24  }
  0xbf   : > { %v820_v26 = vunpack.c.0.s8 %v819_v22  ;;  %vm2865_vm5 = vcmask 130048   ;;  %vm2868_vm6 = vcmask 195584   ;;  %s4981_s1 = scalar_lea.vmem [#allocation3], %s4335_s15  ;;  %s4983_s3 = scalar_lea.vmem [#allocation8], %s4335_s15  ;;  %vm3096_vm7 = vcmask 523264  }
  0xc0   : > { %v852_v30 = vunpack.c.0.s8 %v851_v25  ;;  %s4984_s21 = scalar_lea.vmem [#allocation9], %s4335_s15  ;;  %p3507_p1 = scmp.ne.s32.totalorder %s4178_s22, 1 }
  0xc1   : > { %3567 = vmatpush3.bf16.msra.mxu0 %v3787_v2  ;;  %v4461_v31 = vsub.s32 %v820_v26, %v4458_v27 }
  0xc2   : > { %3578 = vmatprep.subr.bf16.mxu0 %v4065_v1  ;;  %v4464_v38 = vsub.s32 %v852_v30, %v4458_v27 }
  0xc4   : > { %3569 = vmatmul.mubr.msk.bf16.vlgmr.msra.gmra.mrb[0].mxu0 %vm749_vm1, %v725_v5 }
  0xc5   : > { %3580 = vmatprep.mubr.msk.bf16.mxu0 %vm4066_vm0, %v4065_v1 }
 0x197   : > { %v787_v7 = vpop.f32.mrb[0].mxu0 }
 0x198   : > { %v788_v8 = vadd.f32 %v3453_v6, %v787_v7  ;;  %v3570_v9 = vpop.f32.mrb[1].mxu0 }
 0x199   : > { %v790_v10 = vpop.f32.mrb[2].mxu0 }
 0x19a   : > { %1106 = vrot.lane.b32.xlu1 %v788_v8, %s4067_s17  ;;  %1098 = vrot.lane.b32.xlu0 %v788_v8, %s4068_s16  ;;  %v3571_v11 = vpop.f32.mrb[3].mxu0  ;;  %v791_v12 = vadd.f32 %v3453_v6, %v790_v10  ;;  %v4431_v16 = vmul.f32 0.35355338, %v788_v8 }
 0x19c   : > { %v4443_v19 = vmul.f32 0.35355338, %v791_v12 }
 0x19e   : > { %1102 = vrot.lane.b32.xlu0 %v788_v8, %s4069_s18  ;;  %1100 = vrot.lane.b32.xlu1 %v791_v12, %s4068_s16 }
 0x1a2   : > { %1104 = vrot.lane.b32.xlu0 %v791_v12, %s4069_s18  ;;  %1108 = vrot.lane.b32.xlu1 %v791_v12, %s4067_s17 }
 0x1a6   : > { %1110 = vrot.lane.b32.xlu0 %v788_v8, %s4070_s12 }
 0x20c   : > { %v1099_v13 = vpop.permute.xlu0 %1098  ;;  %v1107_v14 = vpop.permute.xlu1 %1106 }
 0x20d   : > { %1114 = vrot.lane.b32.xlu1 %v1099_v13, %s4070_s12 }
 0x210   : > { %v1103_v15 = vpop.permute.xlu0 %1102  ;;  %v4437_v17 = vpop.permute.xlu1 %1100 }
 0x211   : > { %1118 = vrot.lane.b32.xlu0 %v1103_v15, %s4070_s12  ;;  %1122 = vrot.lane.b32.xlu1 %v1107_v14, %s4070_s12 }
 0x214   : > { %v4439_v18 = vpop.permute.xlu0 %1104  ;;  %v4445_v20 = vpop.permute.xlu1 %1108 }
 0x215   : > { %798 = vrot.lane.b32.xlu0 %v4431_v16, %s4068_s16  ;;  %804 = vrot.lane.b32.xlu1 %v4431_v16, %s4069_s18 }
 0x218   : > { %v1111_v28 = vpop.permute.xlu0 %1110 }
 0x219   : > { %810 = vrot.lane.b32.xlu0 %v4431_v16, %s4067_s17  ;;  %1112 = vrot.lane.b32.xlu1 %v791_v12, %s4070_s12 }
 0x21d   : > { %1120 = vrot.lane.b32.xlu1 %v4439_v18, %s4070_s12  ;;  %1116 = vrot.lane.b32.xlu0 %v4437_v17, %s4070_s12 }
 0x221   : > { %1124 = vrot.lane.b32.xlu0 %v4445_v20, %s4070_s12  ;;  %800 = vrot.lane.b32.xlu1 %v4443_v19, %s4068_s16  ;;  %s4987_s12 = sld [smem:[#allocation32_spill]] (!%p3507_p1) }
 0x225   : > { %806 = vrot.lane.b32.xlu0 %v4443_v19, %s4069_s18  ;;  %812 = vrot.lane.b32.xlu1 %v4443_v19, %s4067_s17 }
 0x229   : > { %1414 = vrot.lane.b32.xlu0 %v788_v8, %s4071_s28  ;;  %1418 = vrot.lane.b32.xlu1 %v1099_v13, %s4071_s28 }
 0x22d   : > { %1422 = vrot.lane.b32.xlu0 %v1103_v15, %s4071_s28  ;;  %1426 = vrot.lane.b32.xlu1 %v1107_v14, %s4071_s28 }
 0x231   : > { %1416 = vrot.lane.b32.xlu1 %v791_v12, %s4071_s28 }
 0x27f   : > { %v1115_v29 = vpop.permute.xlu1 %1114 }
 0x283   : > { %v1119_v32 = vpop.permute.xlu0 %1118  ;;  %v1123_v33 = vpop.permute.xlu1 %1122 }
 0x284   : > { %v1134_v34 = vcombine.low %v1111_v28, %v1119_v32  ;;  %v1135_v35 = vcombine.high %v1111_v28, %v1119_v32  ;;  %v1150_v36 = vcombine.low %v1115_v29, %v1123_v33  ;;  %v1151_v37 = vcombine.high %v1115_v29, %v1123_v33 }
 0x286   : > { %v1142_v39 = vrot.slane %v1134_v34, %v4461_v31  ;;  %v1149_v40 = vrot.slane %v1135_v35, %v4461_v31  ;;  %v1158_v41 = vrot.slane %v1150_v36, %v4461_v31  ;;  %v1165_v42 = vrot.slane %v1151_v37, %v4461_v31 }
 0x287   : > { %v799_v43 = vpop.permute.xlu0 %798  ;;  %v805_v44 = vpop.permute.xlu1 %804 }
 0x288   : > { %v1166_v45 = vcombine.low %v1142_v39, %v1158_v41  ;;  %v1167_v46 = vcombine.high %v1142_v39, %v1158_v41  ;;  %v1182_v47 = vcombine.low %v1149_v40, %v1165_v42  ;;  %v1183_v48 = vcombine.high %v1149_v40, %v1165_v42 }
 0x289   : > { %v816_v53 = vcombine.low %v4431_v16, %v805_v44  ;;  %v817_v54 = vcombine.high %v4431_v16, %v805_v44 }
 0x28a   : > { %v1174_v49 = vrot.slane %v1166_v45, %v4464_v38  ;;  %v1181_v50 = vrot.slane %v1167_v46, %v4464_v38  ;;  %v1190_v51 = vrot.slane %v1182_v47, %v4464_v38  ;;  %v1197_v52 = vrot.slane %v1183_v48, %v4464_v38 }
 0x28b   : > { %v811_v55 = vpop.permute.xlu0 %810  ;;  %v1113_v56 = vpop.permute.xlu1 %1112  ;;  %v824_v4 = vrot.slane %v816_v53, %v4461_v31  ;;  %v831_v5 = vrot.slane %v817_v54, %v4461_v31 }
 0x28c   : > { %v1270_v57 = vcombine.low %v1174_v49, %v1181_v50  ;;  %v3461_v58 = vcombine.high %v1174_v49, %v1181_v50  ;;  %v1286_v59 = vcombine.low %v1190_v51, %v1197_v52  ;;  %v3462_v60 = vcombine.high %v1190_v51, %v1197_v52 }
 0x28d   : > { %v832_v61 = vcombine.low %v799_v43, %v811_v55  ;;  %v833_v62 = vcombine.high %v799_v43, %v811_v55 }
 0x28e   : > { %v4477_v63 = vrot.slane %v1270_v57, %v4461_v31  ;;  %v4480_v0 = vrot.slane %v3461_v58, %v4461_v31  ;;  %v4483_v2 = vrot.slane %v1286_v59, %v4461_v31  ;;  %v4486_v3 = vrot.slane %v3462_v60, %v4461_v31 }
 0x28f   : > { %v840_v6 = vrot.slane %v832_v61, %v4461_v31  ;;  %v847_v7 = vrot.slane %v833_v62, %v4461_v31  ;;  %v1117_v8 = vpop.permute.xlu0 %1116  ;;  %v1121_v9 = vpop.permute.xlu1 %1120 }
 0x290   : > { %v1302_v10 = vcombine.low %v4477_v63, %v4480_v0  ;;  %v1318_v11 = vcombine.low %v4483_v2, %v4486_v3  ;;  %v1202_v16 = vcombine.low %v1113_v56, %v1121_v9  ;;  %v1203_v21 = vcombine.high %v1113_v56, %v1121_v9 }
 0x291   : > { %v848_v12 = vcombine.low %v824_v4, %v840_v6  ;;  %v849_v13 = vcombine.high %v824_v4, %v840_v6  ;;  %v864_v14 = vcombine.low %v831_v5, %v847_v7  ;;  %v865_v15 = vcombine.high %v831_v5, %v847_v7 }
 0x292   : > { %v1310_v22 = vrot.slane %v1302_v10, %v4464_v38  ;;  %v1326_v24 = vrot.slane %v1318_v11, %v4464_v38  ;;  %v1210_v37 = vrot.slane %v1202_v16, %v4461_v31  ;;  %v1217_v39 = vrot.slane %v1203_v21, %v4461_v31 }
 0x293   : > { %v856_v25 = vrot.slane %v848_v12, %v4464_v38  ;;  %v863_v26 = vrot.slane %v849_v13, %v4464_v38  ;;  %v872_v28 = vrot.slane %v864_v14, %v4464_v38  ;;  %v879_v29 = vrot.slane %v865_v15, %v4464_v38  ;;  %v1125_v30 = vpop.permute.xlu0 %1124  ;;  %v801_v32 = vpop.permute.xlu1 %800 }
 0x294   : > { %v1218_v33 = vcombine.low %v1117_v8, %v1125_v30  ;;  %v1219_v34 = vcombine.high %v1117_v8, %v1125_v30  ;;  %v1334_v35 = vcombine.low %v1310_v22, %v1326_v24  ;;  %v1335_v36 = vcombine.high %v1310_v22, %v1326_v24 }
 0x295   : > { %v952_v42 = vcombine.low %v856_v25, %v863_v26  ;;  %v3457_v43 = vcombine.high %v856_v25, %v863_v26  ;;  %v968_v44 = vcombine.low %v872_v28, %v879_v29  ;;  %v3458_v45 = vcombine.high %v872_v28, %v879_v29 }
 0x296   : > { %v1226_v40 = vrot.slane %v1218_v33, %v4461_v31  ;;  %v1233_v41 = vrot.slane %v1219_v34, %v4461_v31  ;;  %v1406_v54 = vpack.c.bf16 %v1334_v35, %v1334_v35  ;;  %v1407_v55 = vpack.c.bf16 %v1335_v36, %v1335_v36 }
 0x297   : > { %v807_v46 = vpop.permute.xlu0 %806  ;;  %v813_v47 = vpop.permute.xlu1 %812  ;;  %v4518_v7 = vrot.slane %v3457_v43, %v4461_v31  ;;  %v4521_v8 = vrot.slane %v968_v44, %v4461_v31  ;;  %v4524_v9 = vrot.slane %v3458_v45, %v4461_v31 }
 0x298   : > { %v1234_v48 = vcombine.low %v1210_v37, %v1226_v40  ;;  %v1235_v49 = vcombine.high %v1210_v37, %v1226_v40  ;;  %v1250_v50 = vcombine.low %v1217_v39, %v1233_v41  ;;  %v1251_v51 = vcombine.high %v1217_v39, %v1233_v41 }
 0x299   : > { %v884_v52 = vcombine.low %v4443_v19, %v807_v46  ;;  %v885_v53 = vcombine.high %v4443_v19, %v807_v46  ;;  %v900_v62 = vcombine.low %v801_v32, %v813_v47  ;;  %v901_v4 = vcombine.high %v801_v32, %v813_v47 }
 0x29a   : > { %v1242_v56 = vrot.slane %v1234_v48, %v4464_v38  ;;  %v1249_v57 = vrot.slane %v1235_v49, %v4464_v38  ;;  %v1258_v58 = vrot.slane %v1250_v50, %v4464_v38  ;;  %v1265_v59 = vrot.slane %v1251_v51, %v4464_v38 }
 0x29b   : > { %v892_v60 = vrot.slane %v884_v52, %v4461_v31  ;;  %v899_v61 = vrot.slane %v885_v53, %v4461_v31  ;;  %v1415_v5 = vpop.permute.xlu0 %1414  ;;  %v1419_v6 = vpop.permute.xlu1 %1418  ;;  %v4515_v19 = vrot.slane %v952_v42, %v4461_v31  ;;  %v908_v10 = vrot.slane %v900_v62, %v4461_v31 }
 0x29c   : > { %v915_v11 = vrot.slane %v901_v4, %v4461_v31  ;;  %v1728_v12 = vsel %vm1723_vm2, %v1406_v54, 0  ;;  %v1774_v13 = vsel %vm1723_vm2, %v1407_v55, 0  ;;  %v1338_v14 = vcombine.low %v1242_v56, %v1249_v57 }
 0x29d   : > { %v3463_v15 = vcombine.high %v1242_v56, %v1249_v57  ;;  %v1354_v16 = vcombine.low %v1258_v58, %v1265_v59  ;;  %v3464_v21 = vcombine.high %v1258_v58, %v1265_v59  ;;  %3573 = vmatpush3.bf16.xpose.msra.mxu1 %v1728_v12  ;;  %v916_v22 = vcombine.low %v892_v60, %v908_v10 }
 0x29e   : > { %v917_v24 = vcombine.high %v892_v60, %v908_v10  ;;  %v932_v25 = vcombine.low %v899_v61, %v915_v11  ;;  %v933_v26 = vcombine.high %v899_v61, %v915_v11  ;;  %3579 = vmatpush3.bf16.xpose.msra.mxu0 %v1774_v13  ;;  %3584 = vmatprep.subr.bf16.mxu1 %v4065_v1 }
 0x29f   : > { %v1423_v28 = vpop.permute.xlu0 %1422  ;;  %v1427_v29 = vpop.permute.xlu1 %1426  ;;  %v924_v35 = vrot.slane %v916_v22, %v4464_v38  ;;  %3590 = vmatprep.subr.bf16.mxu0 %v4065_v1  ;;  %v985_v58 = vcombine.high %v4515_v19, %v4518_v7  ;;  %v1001_v59 = vcombine.high %v4521_v8, %v4524_v9  ;;  %v1345_v60 = vrot.slane %v1338_v14, %v4461_v31 }
 0x2a0   : > { %v1438_v30 = vcombine.low %v1415_v5, %v1423_v28  ;;  %v1439_v32 = vcombine.high %v1415_v5, %v1423_v28  ;;  %v1454_v33 = vcombine.low %v1419_v6, %v1427_v29  ;;  %v1455_v34 = vcombine.high %v1419_v6, %v1427_v29 }
 0x2a1   : > { %v931_v36 = vrot.slane %v917_v24, %v4464_v38  ;;  %v940_v37 = vrot.slane %v932_v25, %v4464_v38  ;;  %v947_v39 = vrot.slane %v933_v26, %v4464_v38  ;;  %v1353_v61 = vrot.slane %v3463_v15, %v4461_v31 }
 0x2a2   : > { %v1446_v40 = vrot.slane %v1438_v30, %v4461_v31  ;;  %v1453_v41 = vrot.slane %v1439_v32, %v4461_v31  ;;  %v1462_v42 = vrot.slane %v1454_v33, %v4461_v31  ;;  %v1469_v43 = vrot.slane %v1455_v34, %v4461_v31 }
 0x2a3   : > { %v1020_v44 = vcombine.low %v924_v35, %v931_v36  ;;  %v3459_v45 = vcombine.high %v924_v35, %v931_v36  ;;  %v1036_v46 = vcombine.low %v940_v37, %v947_v39  ;;  %v3460_v47 = vcombine.high %v940_v37, %v947_v39 }
 0x2a4   : > { %v1470_v48 = vcombine.low %v1446_v40, %v1462_v42  ;;  %v1471_v49 = vcombine.high %v1446_v40, %v1462_v42  ;;  %v1486_v50 = vcombine.low %v1453_v41, %v1469_v43  ;;  %v1487_v51 = vcombine.high %v1453_v41, %v1469_v43 }
 0x2a5   : > { %v4541_v52 = vrot.slane %v1020_v44, %v4461_v31  ;;  %v4544_v53 = vrot.slane %v3459_v45, %v4461_v31  ;;  %v4547_v54 = vrot.slane %v1036_v46, %v4461_v31  ;;  %v4550_v55 = vrot.slane %v3460_v47, %v4461_v31 }
 0x2a6   : > { %v1478_v56 = vrot.slane %v1470_v48, %v4464_v38  ;;  %v1485_v57 = vrot.slane %v1471_v49, %v4464_v38  ;;  %v1361_v62 = vrot.slane %v1354_v16, %v4461_v31  ;;  %v1369_v4 = vrot.slane %v3464_v21, %v4461_v31 }
 0x2a7   : > { %v1494_v5 = vrot.slane %v1486_v50, %v4464_v38  ;;  %v1501_v6 = vrot.slane %v1487_v51, %v4464_v38  ;;  %v984_v10 = vcombine.low %v4515_v19, %v4518_v7  ;;  %v1000_v11 = vcombine.low %v4521_v8, %v4524_v9 }
 0x2a8   : > { %v1303_v12 = vcombine.high %v4477_v63, %v4480_v0  ;;  %v1319_v13 = vcombine.high %v4483_v2, %v4486_v3  ;;  %v1052_v14 = vcombine.low %v4541_v52, %v4544_v53  ;;  %v1068_v15 = vcombine.low %v4547_v54, %v4550_v55 }
 0x2a9   : > { %v1574_v16 = vcombine.low %v1478_v56, %v1485_v57  ;;  %v3465_v21 = vcombine.high %v1478_v56, %v1485_v57  ;;  %v992_v22 = vrot.slane %v984_v10, %v4464_v38  ;;  %v1008_v19 = vrot.slane %v1000_v11, %v4464_v38 }
 0x2aa   : > { %v1317_v7 = vrot.slane %v1303_v12, %v4464_v38  ;;  %v1333_v8 = vrot.slane %v1319_v13, %v4464_v38  ;;  %v1590_v63 = vcombine.low %v1494_v5, %v1501_v6  ;;  %v3466_v0 = vcombine.high %v1494_v5, %v1501_v6 }
 0x2ab   : > { %v1370_v9 = vcombine.low %v1345_v60, %v1353_v61  ;;  %v1386_v2 = vcombine.low %v1361_v62, %v1369_v4  ;;  %v1016_v3 = vcombine.low %v992_v22, %v1008_v19  ;;  %v1017_v24 = vcombine.high %v992_v22, %v1008_v19 }
 0x2ac   : > { %v1336_v25 = vcombine.low %v1317_v7, %v1333_v8  ;;  %v1337_v26 = vcombine.high %v1317_v7, %v1333_v8  ;;  %v999_v28 = vrot.slane %v985_v58, %v4464_v38  ;;  %v1015_v29 = vrot.slane %v1001_v59, %v4464_v38 }
 0x2ad   : > { %v1378_v30 = vrot.slane %v1370_v9, %v4464_v38  ;;  %v1394_v32 = vrot.slane %v1386_v2, %v4464_v38  ;;  %v1088_v33 = vpack.c.bf16 %v1016_v3, %v1016_v3  ;;  %v1089_v34 = vpack.c.bf16 %v1017_v24, %v1017_v24 }
 0x2ae   : > { %v1408_v35 = vpack.c.bf16 %v1336_v25, %v1336_v25  ;;  %v1409_v36 = vpack.c.bf16 %v1337_v26, %v1337_v26  ;;  %v1581_v37 = vrot.slane %v1574_v16, %v4461_v31  ;;  %v1589_v39 = vrot.slane %v3465_v21, %v4461_v31 }
 0x2af   : > { %v1402_v40 = vcombine.low %v1378_v30, %v1394_v32  ;;  %v1403_v41 = vcombine.high %v1378_v30, %v1394_v32  ;;  %v1597_v42 = vrot.slane %v1590_v63, %v4461_v31  ;;  %v1605_v43 = vrot.slane %v3466_v0, %v4461_v31  ;;  %3575 = vmatmul.mubr.msk.bf16.vlgmr.msra.gmra.mrb[0].mxu1 %vm1723_vm2, %v1088_v33 }
 0x2b0   : > { %3581 = vmatmul.mubr.msk.bf16.vlgmr.msra.gmra.mrb[4].mxu0 %vm1723_vm2, %v1089_v34  ;;  %v1820_v44 = vsel %vm1723_vm2, %v1408_v35, 0  ;;  %v1866_v45 = vsel %vm1723_vm2, %v1409_v36, 0  ;;  %v1018_v46 = vcombine.low %v999_v28, %v1015_v29  ;;  %v1019_v47 = vcombine.high %v999_v28, %v1015_v29  ;;  %3586 = vmatprep.mubr.msk.bf16.mxu1 %vm4066_vm0, %v4065_v1 }
 0x2b1   : > { %3585 = vmatpush3.bf16.xpose.msra.mxu1 %v1820_v44  ;;  %3591 = vmatpush3.bf16.xpose.msra.mxu0 %v1866_v45  ;;  %v1371_v48 = vcombine.high %v1345_v60, %v1353_v61  ;;  %v1410_v49 = vpack.c.bf16 %v1402_v40, %v1402_v40  ;;  %v1411_v50 = vpack.c.bf16 %v1403_v41, %v1403_v41 }
 0x2b2   : > { %3592 = vmatprep.mubr.msk.bf16.mxu0 %vm4066_vm0, %v4065_v1  ;;  %v1387_v51 = vcombine.high %v1361_v62, %v1369_v4  ;;  %3596 = vmatprep.subr.bf16.mxu1 %v4065_v1  ;;  %v1060_v58 = vrot.slane %v1052_v14, %v4464_v38  ;;  %v1076_v59 = vrot.slane %v1068_v15, %v4464_v38 }
 0x2b3   : > { %3602 = vmatprep.subr.bf16.mxu0 %v4065_v1  ;;  %v1385_v56 = vrot.slane %v1371_v48, %v4464_v38  ;;  %v1607_v60 = vcombine.high %v1581_v37, %v1589_v39  ;;  %v1623_v61 = vcombine.high %v1597_v42, %v1605_v43  ;;  %v1090_v5 = vpack.c.bf16 %v1018_v46, %v1018_v46 }
 0x2b4   : > { %v1401_v57 = vrot.slane %v1387_v51, %v4464_v38  ;;  %v1091_v6 = vpack.c.bf16 %v1019_v47, %v1019_v47  ;;  %v1912_v10 = vsel %vm1723_vm2, %v1410_v49, 0  ;;  %v1958_v62 = vsel %vm1723_vm2, %v1411_v50, 0 }
 0x2b5   : > { %v1606_v4 = vcombine.low %v1581_v37, %v1589_v39  ;;  %v1621_v11 = vrot.slane %v1607_v60, %v4464_v38  ;;  %v1637_v12 = vrot.slane %v1623_v61, %v4464_v38  ;;  %v1622_v15 = vcombine.low %v1597_v42, %v1605_v43 }
 0x2b6   : > { %v1404_v13 = vcombine.low %v1385_v56, %v1401_v57  ;;  %v1405_v14 = vcombine.high %v1385_v56, %v1401_v57  ;;  %v1053_v16 = vcombine.high %v4541_v52, %v4544_v53  ;;  %v1069_v21 = vcombine.high %v4547_v54, %v4550_v55 }
 0x2b7   : > { %v1084_v22 = vcombine.low %v1060_v58, %v1076_v59  ;;  %v1085_v19 = vcombine.high %v1060_v58, %v1076_v59  ;;  %v4616_v7 = vcombine.low %v1621_v11, %v1637_v12  ;;  %v4618_v8 = vcombine.high %v1621_v11, %v1637_v12 }
 0x2b8   : > { %3587 = vmatmul.mubr.msk.bf16.vlgmr.msra.gmra.mrb[4].mxu1 %vm1723_vm2, %v1090_v5  ;;  %3593 = vmatmul.mubr.msk.bf16.vlgmr.msra.gmra.mrb[8].mxu0 %vm1723_vm2, %v1091_v6  ;;  %v1412_v52 = vpack.c.bf16 %v1404_v13, %v1404_v13  ;;  %v1413_v53 = vpack.c.bf16 %v1405_v14, %v1405_v14  ;;  %v1614_v54 = vrot.slane %v1606_v4, %v4464_v38  ;;  %v1721_v37 = vand.u32 127, %v821_v23 }
 0x2b9   : > { %3597 = vmatpush3.bf16.xpose.msra.mxu1 %v1912_v10  ;;  %3603 = vmatpush3.bf16.xpose.msra.mxu0 %v1958_v62  ;;  %v1630_v55 = vrot.slane %v1622_v15, %v4464_v38  ;;  %v1092_v63 = vpack.c.bf16 %v1084_v22, %v1084_v22  ;;  %v1093_v0 = vpack.c.bf16 %v1085_v19, %v1085_v19 }
 0x2ba   : > { %3598 = vmatprep.mubr.msk.bf16.mxu1 %vm4066_vm0, %v4065_v1  ;;  %3604 = vmatprep.mubr.msk.bf16.mxu0 %vm4066_vm0, %v4065_v1  ;;  %v1067_v9 = vrot.slane %v1053_v16, %v4464_v38  ;;  %v1083_v2 = vrot.slane %v1069_v21, %v4464_v38  ;;  %v2004_v3 = vsel %vm1723_vm2, %v1412_v52, 0  ;;  %v2050_v24 = vsel %vm1723_vm2, %v1413_v53, 0 }
 0x2bb   : > { %3608 = vmatprep.subr.bf16.mxu1 %v4065_v1  ;;  %3614 = vmatprep.subr.bf16.mxu0 %v4065_v1  ;;  %v1638_v25 = vcombine.low %v1614_v54, %v1630_v55  ;;  %v1639_v26 = vcombine.high %v1614_v54, %v1630_v55  ;;  %vm4648_vm4 = vcmp.le.s32.totalorder %v1721_v37, %v4458_v27 }
 0x2bc   : > { %v1086_v28 = vcombine.low %v1067_v9, %v1083_v2  ;;  %v1087_v29 = vcombine.high %v1067_v9, %v1083_v2 }
 0x2bd   : > { %v1710_v30 = vpack.c.bf16 %v1638_v25, %v1638_v25  ;;  %v1711_v32 = vpack.c.bf16 %v1639_v26, %v1639_v26 }
 0x2be   : > { %v1094_v33 = vpack.c.bf16 %v1086_v28, %v1086_v28  ;;  %v1095_v34 = vpack.c.bf16 %v1087_v29, %v1087_v29 }
 0x2bf   : > { %v2187_v35 = vsel %vm2185_vm3, %v1710_v30, 0  ;;  %v2233_v36 = vsel %vm2185_vm3, %v1711_v32, 0  ;;  %v4691_v30 = vpop.permute.xlu1 %1416 }
 0x2c0   : > { %3599 = vmatmul.mubr.msk.bf16.vlgmr.msra.gmra.mrb[8].mxu1 %vm1723_vm2, %v1092_v63  ;;  %3605 = vmatmul.mubr.msk.bf16.vlgmr.msra.gmra.mrb[12].mxu0 %vm1723_vm2, %v1093_v0 }
 0x2c1   : > { %3609 = vmatpush3.bf16.xpose.msra.mxu1 %v2004_v3  ;;  %3615 = vmatpush3.bf16.xpose.msra.mxu0 %v2050_v24 }
 0x2c2   : > { %3610 = vmatprep.mubr.msk.bf16.mxu1 %vm4066_vm0, %v4065_v1  ;;  %3616 = vmatprep.mubr.msk.bf16.mxu0 %vm4066_vm0, %v4065_v1 }
 0x2c3   : > { %3620 = vmatprep.subr.bf16.mxu1 %v4065_v1  ;;  %3626 = vmatprep.subr.bf16.mxu0 %v4065_v1 }
 0x2c8   : > { %3611 = vmatmul.mubr.msk.bf16.vlgmr.msra.gmra.mrb[12].mxu1 %vm1723_vm2, %v1094_v33  ;;  %3617 = vmatmul.mubr.msk.bf16.vlgmr.msra.gmra.mrb[16].mxu0 %vm1723_vm2, %v1095_v34 }
 0x2c9   : > { %3621 = vmatpush3.bf16.msra.mxu1 %v2187_v35  ;;  %3627 = vmatpush3.bf16.msra.mxu0 %v2233_v36 }
 0x2ca   : > { %3622 = vmatprep.mubr.msk.bf16.mxu1 %vm4066_vm0, %v4065_v1  ;;  %3628 = vmatprep.mubr.msk.bf16.mxu0 %vm4066_vm0, %v4065_v1 }
 0x2cb   : > { %3632 = vmatprep.subr.bf16.mxu1 %v4065_v1  ;;  %3638 = vmatprep.subr.bf16.mxu0 %v4065_v1 }
 0x382   : > { %v1764_v40 = vpop.f32.mrb[0].mxu1 }
 0x383   : > { %v1810_v41 = vpop.f32.mrb[4].mxu0  ;;  %v2094_v42 = vsel %vm4648_vm4, %v1764_v40, -1e+30  ;;  %v3576_v44 = vpop.f32.mrb[1].mxu1 }
 0x384   : > { %v2095_v43 = vsel %vm4648_vm4, %v1810_v41, -1e+30  ;;  %v3582_v45 = vpop.f32.mrb[5].mxu0  ;;  %v1767_v46 = vpop.f32.mrb[2].mxu1  ;;  %v2102_v48 = vsel %vm1723_vm2, %v2094_v42, -inf  ;;  %v1712_v44 = vpack.c.bf16 %v4616_v7, %v4616_v7 }
 0x385   : > { %v1813_v47 = vpop.f32.mrb[6].mxu0  ;;  %v2105_v23 = vsel %vm1723_vm2, %v2095_v43, -inf  ;;  %v3577_v27 = vpop.f32.mrb[3].mxu1  ;;  %2103 = vmax.xlane.f32.xlu0 %v2102_v48 }
 0x386   : > { %2106 = vmax.xlane.f32.xlu1 %v2105_v23  ;;  %v3583_v49 = vpop.f32.mrb[7].mxu0 }
 0x38b   : > { %v1856_v50 = vpop.f32.mrb[4].mxu1  ;;  %v1902_v51 = vpop.f32.mrb[8].mxu0 }
 0x38c   : > { %v2096_v56 = vsel %vm4648_vm4, %v1856_v50, -1e+30  ;;  %v2097_v57 = vsel %vm4648_vm4, %v1902_v51, -1e+30  ;;  %v3588_v58 = vpop.f32.mrb[5].mxu1  ;;  %v3594_v59 = vpop.f32.mrb[9].mxu0 }
 0x38d   : > { %v1859_v60 = vpop.f32.mrb[6].mxu1  ;;  %v1905_v61 = vpop.f32.mrb[10].mxu0  ;;  %v2108_v5 = vsel %vm1723_vm2, %v2096_v56, -inf  ;;  %v2111_v6 = vsel %vm1723_vm2, %v2097_v57, -inf  ;;  %v2279_v50 = vsel %vm2185_vm3, %v1712_v44, 0 }
 0x38e   : > { %v3589_v10 = vpop.f32.mrb[7].mxu1  ;;  %2109 = vmax.xlane.f32.xlu0 %v2108_v5  ;;  %2112 = vmax.xlane.f32.xlu1 %v2111_v6  ;;  %v3595_v62 = vpop.f32.mrb[11].mxu0 }
 0x393   : > { %v1948_v4 = vpop.f32.mrb[8].mxu1  ;;  %v1994_v11 = vpop.f32.mrb[12].mxu0 }
 0x394   : > { %v2098_v12 = vsel %vm4648_vm4, %v1948_v4, -1e+30  ;;  %v3600_v13 = vpop.f32.mrb[9].mxu1  ;;  %v3606_v14 = vpop.f32.mrb[13].mxu0  ;;  %v4669_v22 = vsel %vm4648_vm4, %v1994_v11, -1e+30 }
 0x395   : > { %v1951_v15 = vpop.f32.mrb[10].mxu1  ;;  %v1997_v16 = vpop.f32.mrb[14].mxu0  ;;  %v2114_v21 = vsel %vm1723_vm2, %v2098_v12, -inf  ;;  %v2117_v53 = vsel %vm1723_vm2, %v4669_v22, -inf }
 0x396   : > { %2115 = vmax.xlane.f32.xlu0 %v2114_v21  ;;  %v3601_v19 = vpop.f32.mrb[11].mxu1  ;;  %v3607_v52 = vpop.f32.mrb[15].mxu0 }
 0x39a   : > { %2118 = vmax.xlane.f32.xlu0 %v2117_v53 }
 0x39b   : > { %v2040_v54 = vpop.f32.mrb[12].mxu1  ;;  %v2086_v55 = vpop.f32.mrb[16].mxu0 }
 0x39c   : > { %v4675_v63 = vsel %vm4648_vm4, %v2040_v54, -1e+30  ;;  %v4679_v0 = vsel %vm4648_vm4, %v2086_v55, -1e+30  ;;  %v3612_v9 = vpop.f32.mrb[13].mxu1  ;;  %v3618_v2 = vpop.f32.mrb[17].mxu0 }
 0x39d   : > { %v2043_v3 = vpop.f32.mrb[14].mxu1  ;;  %v2089_v24 = vpop.f32.mrb[18].mxu0  ;;  %v2123_v28 = vsel %vm1723_vm2, %v4679_v0, -inf  ;;  %v2120_v29 = vsel %vm1723_vm2, %v4675_v63, -inf }
 0x39e   : > { %v3613_v25 = vpop.f32.mrb[15].mxu1  ;;  %v3619_v26 = vpop.f32.mrb[19].mxu0 }
 0x39f   : > { %1424 = vrot.lane.b32.xlu1 %v4439_v18, %s4071_s28 }
 0x3a3   : > { %1428 = vrot.lane.b32.xlu1 %v4445_v20, %s4071_s28 }
 0x3b0   : > { %1420 = vrot.lane.b32.xlu0 %v4437_v17, %s4071_s28 }
 0x3c7   : > { %2124 = vmax.xlane.f32.xlu1 %v2123_v28 }
 0x3cf   : > { %2121 = vmax.xlane.f32.xlu0 %v2120_v29 }
 0x412   : > { %v2104_v32 = vpop.xlane.xlu0 %2103 }
 0x413   : > { %v2107_v33 = vpop.xlane.xlu1 %2106  ;;  %v2126_v34 = vsub.f32 %v2094_v42, %v2104_v32  ;;  %v1713_v42 = vpack.c.bf16 %v4618_v8, %v4618_v8 }
 0x414   : > { %v2127_v18 = vsub.f32 %v2095_v43, %v2107_v33 }
 0x415   : > { %v2134_v35 = vmul.f32 1.442695, %v2126_v34  ;;  %v2325_v7 = vsel %vm2185_vm3, %v1713_v42, 0 }
 0x416   : > { %v2136_v36 = vmul.f32 1.442695, %v2127_v18 }
 0x417   : > { %3796 = vpow2.f32 %v2134_v35 }
 0x418   : > { %3798 = vpow2.f32 %v2136_v36 }
 0x41b   : > { %v2110_v20 = vpop.xlane.xlu0 %2109  ;;  %v2113_v17 = vpop.xlane.xlu1 %2112 }
 0x41c   : > { %v2128_v37 = vsub.f32 %v2096_v56, %v2110_v20  ;;  %v2129_v39 = vsub.f32 %v2097_v57, %v2113_v17 }
 0x41e   : > { %v2138_v40 = vmul.f32 1.442695, %v2128_v37  ;;  %v2140_v41 = vmul.f32 1.442695, %v2129_v39 }
 0x41f   : > { %v1425_v49 = vpop.permute.xlu1 %1424 }
 0x420   : > { %3800 = vpow2.f32 %v2138_v40  ;;  %v1506_v59 = vcombine.low %v4691_v30, %v1425_v49  ;;  %v1507_v60 = vcombine.high %v4691_v30, %v1425_v49 }
 0x421   : > { %3802 = vpow2.f32 %v2140_v41  ;;  %v3797_v45 = vpop.eup %3796 }
 0x422   : > { %v3799_v43 = vpop.eup %3798  ;;  %v2150_v47 = vsel %vm1723_vm2, %v3797_v45, 0.0  ;;  %v2174_v48 = vpack.c.bf16 %v3797_v45, %v3797_v45  ;;  %v1514_v15 = vrot.slane %v1506_v59, %v4461_v31  ;;  %v1521_v16 = vrot.slane %v1507_v60, %v4461_v31 }
 0x423   : > { %v2116_v46 = vpop.xlane.xlu0 %2115  ;;  %2151 = vadd.xlane.f32.xlu0 %v2150_v47  ;;  %v2175_v27 = vpack.c.bf16 %v3799_v43, %v3799_v43  ;;  %v2153_v56 = vsel %vm1723_vm2, %v3799_v43, 0.0  ;;  %v1429_v6 = vpop.permute.xlu1 %1428 }
 0x424   : > { %v2130_v23 = vsub.f32 %v2098_v12, %v2116_v46  ;;  %3623 = vmatmul.mubr.msk.bf16.vlgmr.msra.gmra.mrb[16].mxu1 %vm1723_vm2, %v2174_v48 }
 0x425   : > { %3629 = vmatmul.mubr.msk.bf16.vlgmr.msra.gmra.mrb[20].mxu0 %vm1723_vm2, %v2175_v27  ;;  %3633 = vmatpush3.bf16.msra.mxu1 %v2279_v50 }
 0x426   : > { %v2142_v51 = vmul.f32 1.442695, %v2130_v23  ;;  %3639 = vmatpush3.bf16.msra.mxu0 %v2325_v7  ;;  %3634 = vmatprep.mubr.msk.bf16.mxu1 %vm4066_vm0, %v4065_v1 }
 0x427   : > { %v2119_v8 = vpop.xlane.xlu0 %2118  ;;  %2154 = vadd.xlane.f32.xlu0 %v2153_v56  ;;  %3640 = vmatprep.mubr.msk.bf16.mxu0 %vm4066_vm0, %v4065_v1 }
 0x428   : > { %3804 = vpow2.f32 %v2142_v51  ;;  %v2131_v57 = vsub.f32 %v4669_v22, %v2119_v8  ;;  %3644 = vmatprep.subr.bf16.mxu1 %v4065_v1  ;;  %3650 = vmatprep.subr.bf16.mxu0 %v4065_v1 }
 0x42a   : > { %v3801_v58 = vpop.eup %3800  ;;  %v2144_v61 = vmul.f32 1.442695, %v2131_v57 }
 0x42b   : > { %v3803_v5 = vpop.eup %3802  ;;  %v1421_v10 = vpop.permute.xlu0 %1420  ;;  %v2156_v62 = vsel %vm1723_vm2, %v3801_v58, 0.0  ;;  %v2176_v4 = vpack.c.bf16 %v3801_v58, %v3801_v58 }
 0x42c   : > { %3806 = vpow2.f32 %v2144_v61  ;;  %v1522_v11 = vcombine.low %v1421_v10, %v1429_v6  ;;  %v1523_v12 = vcombine.high %v1421_v10, %v1429_v6  ;;  %v2159_v13 = vsel %vm1723_vm2, %v3803_v5, 0.0  ;;  %2157 = vadd.xlane.f32.xlu1 %v2156_v62 }
 0x42d   : > { %2160 = vadd.xlane.f32.xlu0 %v2159_v13  ;;  %3635 = vmatmul.mubr.msk.bf16.vlgmr.msra.gmra.mrb[20].mxu1 %vm1723_vm2, %v2176_v4  ;;  %v2177_v14 = vpack.c.bf16 %v3803_v5, %v3803_v5 }
 0x42e   : > { %v1530_v21 = vrot.slane %v1522_v11, %v4461_v31  ;;  %v1537_v22 = vrot.slane %v1523_v12, %v4461_v31  ;;  %3646 = vmatprep.mubr.msk.bf16.mxu1 %vm4066_vm0, %v4065_v1 }
 0x42f   : > { %3641 = vmatmul.mubr.msk.bf16.vlgmr.msra.gmra.mrb[24].mxu0 %vm1723_vm2, %v2177_v14 }
 0x430   : > { %v1538_v19 = vcombine.low %v1514_v15, %v1530_v21  ;;  %v1539_v52 = vcombine.high %v1514_v15, %v1530_v21  ;;  %v1554_v53 = vcombine.low %v1521_v16, %v1537_v22  ;;  %v1555_v54 = vcombine.high %v1521_v16, %v1537_v22  ;;  %3652 = vmatprep.mubr.msk.bf16.mxu0 %vm4066_vm0, %v4065_v1 }
 0x432   : > { %v3805_v55 = vpop.eup %3804  ;;  %v1546_v9 = vrot.slane %v1538_v19, %v4464_v38  ;;  %v1553_v2 = vrot.slane %v1539_v52, %v4464_v38  ;;  %v1562_v3 = vrot.slane %v1554_v53, %v4464_v38  ;;  %v1569_v24 = vrot.slane %v1555_v54, %v4464_v38 }
 0x433   : > { %v2162_v25 = vsel %vm1723_vm2, %v3805_v55, 0.0  ;;  %v2178_v7 = vpack.c.bf16 %v3805_v55, %v3805_v55 }
 0x434   : > { %v1642_v26 = vcombine.low %v1546_v9, %v1553_v2  ;;  %v3467_v28 = vcombine.high %v1546_v9, %v1553_v2  ;;  %v1658_v29 = vcombine.low %v1562_v3, %v1569_v24  ;;  %v3468_v30 = vcombine.high %v1562_v3, %v1569_v24  ;;  %2163 = vadd.xlane.f32.xlu1 %v2162_v25 }
 0x436   : > { %v3807_v32 = vpop.eup %3806  ;;  %v1649_v33 = vrot.slane %v1642_v26, %v4461_v31  ;;  %v1657_v34 = vrot.slane %v3467_v28, %v4461_v31  ;;  %v1665_v18 = vrot.slane %v1658_v29, %v4461_v31  ;;  %v1673_v35 = vrot.slane %v3468_v30, %v4461_v31 }
 0x437   : > { %v2165_v36 = vsel %vm1723_vm2, %v3807_v32, 0.0  ;;  %v2179_v8 = vpack.c.bf16 %v3807_v32, %v3807_v32 }
 0x438   : > { %2166 = vadd.xlane.f32.xlu0 %v2165_v36  ;;  %v1674_v20 = vcombine.low %v1649_v33, %v1657_v34  ;;  %v1690_v17 = vcombine.low %v1665_v18, %v1673_v35  ;;  %v1675_v37 = vcombine.high %v1649_v33, %v1657_v34  ;;  %v1691_v39 = vcombine.high %v1665_v18, %v1673_v35 }
 0x43a   : > { %v1682_v40 = vrot.slane %v1674_v20, %v4464_v38  ;;  %v1698_v41 = vrot.slane %v1690_v17, %v4464_v38  ;;  %v1689_v44 = vrot.slane %v1675_v37, %v4464_v38  ;;  %v1705_v45 = vrot.slane %v1691_v39, %v4464_v38 }
 0x43c   : > { %v1706_v42 = vcombine.low %v1682_v40, %v1698_v41  ;;  %v1707_v43 = vcombine.high %v1682_v40, %v1698_v41  ;;  %v1708_v46 = vcombine.low %v1689_v44, %v1705_v45  ;;  %v1709_v47 = vcombine.high %v1689_v44, %v1705_v45 }
 0x43e   : > { %v1714_v48 = vpack.c.bf16 %v1706_v42, %v1706_v42  ;;  %v1715_v23 = vpack.c.bf16 %v1707_v43, %v1707_v43  ;;  %v1716_v50 = vpack.c.bf16 %v1708_v46, %v1708_v46  ;;  %v1717_v51 = vpack.c.bf16 %v1709_v47, %v1709_v47 }
 0x440   : > { %v2371_v27 = vsel %vm2185_vm3, %v1714_v48, 0  ;;  %v2417_v49 = vsel %vm2185_vm3, %v1715_v23, 0  ;;  %v2463_v56 = vsel %vm2185_vm3, %v1716_v50, 0  ;;  %v2509_v57 = vsel %vm2185_vm3, %v1717_v51, 0 }
 0x441   : > { %3645 = vmatpush3.bf16.msra.mxu1 %v2371_v27  ;;  %3651 = vmatpush3.bf16.msra.mxu0 %v2417_v49 }
 0x442   : > { %3656 = vmatprep.subr.bf16.mxu1 %v4065_v1  ;;  %3662 = vmatprep.subr.bf16.mxu0 %v4065_v1 }
 0x444   : > { %3647 = vmatmul.mubr.msk.bf16.vlgmr.msra.gmra.mrb[24].mxu1 %vm1723_vm2, %v2178_v7  ;;  %3653 = vmatmul.mubr.msk.bf16.vlgmr.msra.gmra.mrb[28].mxu0 %vm1723_vm2, %v2179_v8 }
 0x445   : > { %3657 = vmatpush3.bf16.msra.mxu1 %v2463_v56  ;;  %3663 = vmatpush3.bf16.msra.mxu0 %v2509_v57 }
 0x446   : > { %3664 = vmatprep.mubr.msk.bf16.mxu0 %vm4066_vm0, %v4065_v1  ;;  %3658 = vmatprep.mubr.msk.bf16.mxu1 %vm4066_vm0, %v4065_v1 }
 0x447   : > { %3668 = vmatprep.subr.bf16.mxu1 %v4065_v1  ;;  %3676 = vmatprep.subr.bf16.mxu0 %v4065_v1 }
 0x454   : > { %v2125_v58 = vpop.xlane.xlu1 %2124 }
 0x455   : > { %v2133_v59 = vsub.f32 %v4679_v0, %v2125_v58 }
 0x457   : > { %v2148_v60 = vmul.f32 1.442695, %v2133_v59 }
 0x459   : > { %3808 = vpow2.f32 %v2148_v60 }
 0x45c   : > { %v2122_v61 = vpop.xlane.xlu0 %2121 }
 0x45d   : > { %v2132_v5 = vsub.f32 %v4675_v63, %v2122_v61 }
 0x45f   : > { %v2146_v6 = vmul.f32 1.442695, %v2132_v5 }
 0x461   : > { %3810 = vpow2.f32 %v2146_v6 }
 0x463   : > { %v3809_v10 = vpop.eup %3808 }
 0x464   : > { %v2171_v62 = vsel %vm1723_vm2, %v3809_v10, 0.0  ;;  %v2181_v4 = vpack.c.bf16 %v3809_v10, %v3809_v10 }
 0x465   : > { %2172 = vadd.xlane.f32.xlu0 %v2171_v62 }
 0x466   : > { %3665 = vmatmul.mubr.msk.bf16.vlgmr.msra.gmra.mrb[32].mxu0 %vm1723_vm2, %v2181_v4 }
 0x467   : > { %3680 = vmatprep.mubr.msk.bf16.mxu0 %vm4066_vm0, %v4065_v1 }
 0x46b   : > { %v3811_v11 = vpop.eup %3810 }
 0x46c   : > { %v2168_v0 = vsel %vm1723_vm2, %v3811_v11, 0.0  ;;  %v2180_v12 = vpack.c.bf16 %v3811_v11, %v3811_v11 }
 0x46d   : > { %2169 = vadd.xlane.f32.xlu1 %v2168_v0 }
 0x46e   : > { %3659 = vmatmul.mubr.msk.bf16.vlgmr.msra.gmra.mrb[28].mxu1 %vm1723_vm2, %v2180_v12 }
 0x46f   : > { %3672 = vmatprep.mubr.msk.bf16.mxu1 %vm4066_vm0, %v4065_v1 }
 0x4b0   : > { %v2152_v63 = vpop.xlane.xlu0 %2151 }
 0x4b1   : > { %3812 = vrcp.f32 %v2152_v63 }
 0x4b4   : > { %v2155_v13 = vpop.xlane.xlu0 %2154 }
 0x4b9   : > { %v2158_v14 = vpop.xlane.xlu1 %2157 }
 0x4ba   : > { %v2161_v15 = vpop.xlane.xlu0 %2160  ;;  %3814 = vrcp.f32 %v2158_v14 }
 0x4bb   : > { %3816 = vrcp.f32 %v2155_v13  ;;  %v3813_v9 = vpop.eup %3812 }
 0x4bc   : > { %3818 = vrcp.f32 %v2161_v15 }
 0x4c4   : > { %v3815_v2 = vpop.eup %3814 }
 0x4c5   : > { %v3817_v24 = vpop.eup %3816 }
 0x4c6   : > { %v3819_v29 = vpop.eup %3818 }
 0x4f7   : > { %v2223_v16 = vpop.f32.mrb[16].mxu1 }
 0x4f8   : > { %v2269_v21 = vpop.f32.mrb[20].mxu0  ;;  %v3624_v22 = vpop.f32.mrb[17].mxu1  ;;  %v2559_v25 = vmul.f32 %v3813_v9, %v2223_v16 }
 0x4f9   : > { %v3630_v19 = vpop.f32.mrb[21].mxu0  ;;  %v2226_v52 = vpop.f32.mrb[18].mxu1  ;;  %v2560_v33 = vmul.f32 %v3817_v24, %v2269_v21 }
 0x4fa   : > { %v2272_v53 = vpop.f32.mrb[22].mxu0  ;;  %v3625_v54 = vpop.f32.mrb[19].mxu1 }
 0x4fb   : > { %v3631_v55 = vpop.f32.mrb[23].mxu0 }
 0x4fc   : > { %v2167_v55 = vpop.xlane.xlu0 %2166 }
 0x4fd   : > { %3820 = vrcp.f32 %v2167_v55  ;;  %v3789_v55 = vld [vmem:[%s4373_s23 + $0x8] sm:$0xff]  }
 0x500   : > { %v2315_v3 = vpop.f32.mrb[20].mxu1  ;;  %v2173_v9 = vpop.xlane.xlu0 %2172 }
 0x501   : > { %v2561_v26 = vmul.f32 %v3815_v2, %v2315_v3  ;;  %v3636_v28 = vpop.f32.mrb[21].mxu1  ;;  %3822 = vrcp.f32 %v2173_v9  ;;  %v2164_v2 = vpop.xlane.xlu1 %2163 }
 0x502   : > { %v2361_v30 = vpop.f32.mrb[24].mxu0  ;;  %v2318_v32 = vpop.f32.mrb[22].mxu1  ;;  %3824 = vrcp.f32 %v2164_v2 }
 0x503   : > { %v2567_v34 = vcombine.low %v2559_v25, %v2561_v26  ;;  %v2568_v18 = vcombine.high %v2559_v25, %v2561_v26  ;;  %v2562_v35 = vmul.f32 %v3819_v29, %v2361_v30  ;;  %v3642_v36 = vpop.f32.mrb[25].mxu0  ;;  %v3637_v20 = vpop.f32.mrb[23].mxu1 }
 0x504   : > { %v2364_v17 = vpop.f32.mrb[26].mxu0 }
 0x505   : > { %v2575_v37 = vrot.slane %v2567_v34, %v4461_v31  ;;  %v2582_v39 = vrot.slane %v2568_v18, %v4461_v31  ;;  %v2583_v40 = vcombine.low %v2560_v33, %v2562_v35  ;;  %v2584_v41 = vcombine.high %v2560_v33, %v2562_v35  ;;  %v3643_v44 = vpop.f32.mrb[27].mxu0  ;;  %v2170_v3 = vpop.xlane.xlu1 %2169 }
 0x506   : > { %3826 = vrcp.f32 %v2170_v3 }
 0x507   : > { %v2591_v45 = vrot.slane %v2583_v40, %v4461_v31  ;;  %v2598_v42 = vrot.slane %v2584_v41, %v4461_v31  ;;  %v3821_v24 = vpop.eup %3820 }
 0x509   : > { %v2599_v43 = vcombine.low %v2575_v37, %v2591_v45  ;;  %v2600_v46 = vcombine.high %v2575_v37, %v2591_v45  ;;  %v2615_v47 = vcombine.low %v2582_v39, %v2598_v42  ;;  %v2616_v48 = vcombine.high %v2582_v39, %v2598_v42 }
 0x50b   : > { %v2607_v23 = vrot.slane %v2599_v43, %v4464_v38  ;;  %v2614_v27 = vrot.slane %v2600_v46, %v4464_v38  ;;  %v2623_v49 = vrot.slane %v2615_v47, %v4464_v38  ;;  %v2630_v50 = vrot.slane %v2616_v48, %v4464_v38  ;;  %v3823_v25 = vpop.eup %3822 }
 0x50c   : > { %v3825_v35 = vpop.eup %3824 }
 0x50d   : > { %v2703_v51 = vcombine.low %v2607_v23, %v2614_v27  ;;  %v3485_v7 = vcombine.high %v2607_v23, %v2614_v27  ;;  %v2719_v8 = vcombine.low %v2623_v49, %v2630_v50  ;;  %v3486_v56 = vcombine.high %v2623_v49, %v2630_v50 }
 0x50f   : > { %v2710_v57 = vrot.slane %v2703_v51, %v4461_v31  ;;  %v2718_v58 = vrot.slane %v3485_v7, %v4461_v31  ;;  %v2726_v59 = vrot.slane %v2719_v8, %v4461_v31  ;;  %v2734_v60 = vrot.slane %v3486_v56, %v4461_v31 }
 0x510   : > { %v3827_v36 = vpop.eup %3826 }
 0x511   : > { %v2736_v61 = vcombine.high %v2710_v57, %v2718_v58  ;;  %v2752_v5 = vcombine.high %v2726_v59, %v2734_v60  ;;  %v2735_v6 = vcombine.low %v2710_v57, %v2718_v58  ;;  %v2751_v10 = vcombine.low %v2726_v59, %v2734_v60  ;;  %v3788_v60 = vld [vmem:[%s4373_s23] sm:$0xff]   ;;  %s4074_s23 = smov 16  }
 0x512   : > { %3669 = vmatpush3.bf16.msra.mxu1 %v3788_v60  ;;  %v3793_v60 = vld [vmem:[%s4384_s14 + $0x8] sm:$0xff]  }
 0x513   : > { %v4775_v62 = vrot.slane %v2736_v61, %v4464_v38  ;;  %v4778_v4 = vrot.slane %v2752_v5, %v4464_v38  ;;  %v4781_v11 = vrot.slane %v2735_v6, %v4464_v38  ;;  %v4784_v0 = vrot.slane %v2751_v10, %v4464_v38  ;;  %3670 = vmatprep.subr.bf16.mxu1 %v4065_v1 }
 0x515   : > { %v2769_v12 = vcombine.low %v4775_v62, %v4778_v4  ;;  %v2767_v63 = vcombine.low %v4781_v11, %v4784_v0  ;;  %v2768_v13 = vcombine.high %v4781_v11, %v4784_v0  ;;  %v2770_v14 = vcombine.high %v4775_v62, %v4778_v4  ;;  %v3489_v11 = vld [vmem:[%s4981_s1] ss:$0 sm:$0xff] }
 0x516   : > { %3671 = vmatpush3.bf16.msra.mxu1 %v3789_v55  ;;  %v3494_v55 = vld [vmem:[%s4983_s3] ss:$0 sm:$0xff] }
 0x517   : > { %v2407_v15 = vpop.f32.mrb[24].mxu1  ;;  %v2453_v16 = vpop.f32.mrb[28].mxu0  ;;  %3684 = vmatprep.subr.bf16.mxu1 %v4065_v1 }
 0x518   : > { %v3648_v21 = vpop.f32.mrb[25].mxu1  ;;  %v3654_v22 = vpop.f32.mrb[29].mxu0  ;;  %v2564_v28 = vmul.f32 %v3821_v24, %v2453_v16  ;;  %v2563_v17 = vmul.f32 %v3825_v35, %v2407_v15 }
 0x519   : > { %v2410_v19 = vpop.f32.mrb[26].mxu1  ;;  %v2456_v52 = vpop.f32.mrb[30].mxu0 }
 0x51a   : > { %v3649_v53 = vpop.f32.mrb[27].mxu1  ;;  %v3655_v54 = vpop.f32.mrb[31].mxu0 }
 0x539   : > { %v2545_v26 = vpop.f32.mrb[32].mxu0 }
 0x53a   : > { %v2566_v29 = vmul.f32 %v3823_v25, %v2545_v26  ;;  %v3666_v30 = vpop.f32.mrb[33].mxu0 }
 0x53b   : > { %v2548_v32 = vpop.f32.mrb[34].mxu0 }
 0x53c   : > { %v2651_v33 = vcombine.low %v2564_v28, %v2566_v29  ;;  %v2652_v34 = vcombine.high %v2564_v28, %v2566_v29  ;;  %v3667_v18 = vpop.f32.mrb[35].mxu0 }
 0x53e   : > { %v2659_v42 = vrot.slane %v2651_v33, %v4461_v31  ;;  %v2666_v43 = vrot.slane %v2652_v34, %v4461_v31 }
 0x541   : > { %v2499_v20 = vpop.f32.mrb[28].mxu1 }
 0x542   : > { %v2565_v37 = vmul.f32 %v3827_v36, %v2499_v20  ;;  %v3660_v39 = vpop.f32.mrb[29].mxu1 }
 0x543   : > { %v2502_v40 = vpop.f32.mrb[30].mxu1 }
 0x544   : > { %v2635_v41 = vcombine.low %v2563_v17, %v2565_v37  ;;  %v2636_v44 = vcombine.high %v2563_v17, %v2565_v37  ;;  %v3661_v45 = vpop.f32.mrb[31].mxu1 }
 0x546   : > { %v2643_v46 = vrot.slane %v2635_v41, %v4461_v31  ;;  %v2650_v47 = vrot.slane %v2636_v44, %v4461_v31  ;;  %v3836_v41 = vld [vmem:[#allocation2] sm:$0xff] }
 0x548   : > { %v2667_v48 = vcombine.low %v2643_v46, %v2659_v42  ;;  %v2668_v23 = vcombine.high %v2643_v46, %v2659_v42  ;;  %v2683_v27 = vcombine.low %v2650_v47, %v2666_v43  ;;  %v2684_v49 = vcombine.high %v2650_v47, %v2666_v43  ;;  %v3837_v42 = vld [vmem:[#allocation2 + $0x8] sm:$0xff] }
 0x54a   : > { %v2675_v50 = vrot.slane %v2667_v48, %v4464_v38  ;;  %v2682_v51 = vrot.slane %v2668_v23, %v4464_v38  ;;  %v2691_v7 = vrot.slane %v2683_v27, %v4464_v38  ;;  %v2698_v8 = vrot.slane %v2684_v49, %v4464_v38 }
 0x54c   : > { %v2771_v56 = vcombine.low %v2675_v50, %v2682_v51  ;;  %v3487_v57 = vcombine.high %v2675_v50, %v2682_v51  ;;  %v2787_v58 = vcombine.low %v2691_v7, %v2698_v8  ;;  %v3488_v59 = vcombine.high %v2691_v7, %v2698_v8 }
 0x54e   : > { %v2778_v61 = vrot.slane %v2771_v56, %v4461_v31  ;;  %v2786_v5 = vrot.slane %v3487_v57, %v4461_v31  ;;  %v2794_v6 = vrot.slane %v2787_v58, %v4461_v31  ;;  %v2802_v10 = vrot.slane %v3488_v59, %v4461_v31  ;;  %v3790_v57 = vld [vmem:[%s4378_s13] sm:$0xff]   ;;  %v3791_v58 = vld [vmem:[%s4378_s13 + $0x8] sm:$0xff]   ;;  %s4982_s13 = scalar_lea.vmem [#allocation6], %s4335_s15 }
 0x54f   : > { %3677 = vmatpush3.bf16.msra.mxu0 %v3790_v57  ;;  %v3792_v59 = vld [vmem:[%s4384_s14] sm:$0xff]  }
 0x550   : > { %v2804_v15 = vcombine.high %v2778_v61, %v2786_v5  ;;  %v2820_v16 = vcombine.high %v2794_v6, %v2802_v10  ;;  %v2803_v21 = vcombine.low %v2778_v61, %v2786_v5  ;;  %v2819_v22 = vcombine.low %v2794_v6, %v2802_v10  ;;  %3678 = vmatprep.subr.bf16.mxu0 %v4065_v1  ;;  %v3506_v57 = vld [vmem:[%s703_s30] ss:$0 sm:$0xff]  ;;  %s4986_s30 = sld [smem:[#allocation31_spill]] (!%p3507_p1) }
 0x552   : > { %v2818_v19 = vrot.slane %v2804_v15, %v4464_v38  ;;  %v2834_v52 = vrot.slane %v2820_v16, %v4464_v38  ;;  %v2811_v53 = vrot.slane %v2803_v21, %v4464_v38  ;;  %v2827_v54 = vrot.slane %v2819_v22, %v4464_v38  ;;  %v3493_v22 = vld [vmem:[%s4982_s13] ss:$0 sm:$0xff] }
 0x553   : > { %3679 = vmatpush3.bf16.msra.mxu0 %v3791_v58 }
 0x554   : > { %v2837_v9 = vcombine.low %v2818_v19, %v2834_v52  ;;  %v2836_v2 = vcombine.high %v2811_v53, %v2827_v54  ;;  %v2835_v3 = vcombine.low %v2811_v53, %v2827_v54  ;;  %v2838_v31 = vcombine.high %v2818_v19, %v2834_v52 }
 0x556   : > { %v3776_v24 = vpack.i.bf16 %v2837_v9, %v2769_v12  ;;  %v3771_v25 = vpack.i.bf16 %v2836_v2, %v2768_v13  ;;  %v3781_v38 = vpack.i.bf16 %v2838_v31, %v2770_v14 }
 0x558   : > { %3777 = vrot.lane.b32.xlu0 %v3776_v24, %s4074_s23  ;;  %3772 = vrot.lane.b32.xlu1 %v3771_v25, %s4075_s25  ;;  %v3794_v24 = vld [vmem:[%s4384_s14 + $0x10] sm:$0xff]   ;;  %v3795_v25 = vld [vmem:[%s4384_s14 + $0x18] sm:$0xff]  }
 0x55c   : > { %3782 = vrot.lane.b32.xlu1 %v3781_v38, %s4076_s29  ;;  %v3495_v38 = vld [vmem:[%s4984_s21] ss:$0 sm:$0xff] }
 0x5ca   : > { %v3778_v26 = vpop.permute.xlu0 %3777  ;;  %v3773_v28 = vpop.permute.xlu1 %3772 }
 0x5cb   : > { %v3775_v29 = vunpack.i.h.bf16 %v3773_v28  ;;  %v3774_v30 = vunpack.i.l.bf16 %v3773_v28  ;;  %v3780_v12 = vunpack.i.h.bf16 %v3778_v26  ;;  %v3779_v32 = vunpack.i.l.bf16 %v3778_v26 }
 0x5cd   : > { %v2863_v62 = vsel %vm1723_vm2, %v2767_v63, %v3774_v30  ;;  %v2864_v4 = vsel %vm1723_vm2, %v2835_v3, %v3775_v29 }
 0x5ce   : > { %v3783_v13 = vpop.permute.xlu1 %3782  ;;  %v2866_v34 = vsel %vm2865_vm5, %v2863_v62, %v3779_v32  ;;  %v2867_v18 = vsel %vm2865_vm5, %v2864_v4, %v3780_v12 }
 0x5cf   : > { %v3785_v14 = vunpack.i.h.bf16 %v3783_v13  ;;  %v3784_v33 = vunpack.i.l.bf16 %v3783_v13 }
 0x5d1   : > { %v2869_v35 = vsel %vm2868_vm6, %v2866_v34, %v3784_v33  ;;  %v2870_v36 = vsel %vm2868_vm6, %v2867_v18, %v3785_v14  ;;  %v3499_v14 = vld [vmem:[%s697_s26] ss:$0 sm:$0xff] }
 0x5d2   : > { %v2871_v20 = vpack.c.bf16 %v2870_v36, %v2869_v35 }
 0x5d4   : > { %3673 = vmatmul.mubr.msk.bf16.vlgmr.msra.gmra.mrb[32].mxu1 %vm749_vm1, %v2871_v20 }
 0x5d5   : > { %3692 = vmatprep.mubr.msk.bf16.mxu1 %vm4066_vm0, %v4065_v1  ;;  %3685 = vmatpush3.bf16.msra.mxu1 %v3792_v59 }
 0x5d6   : > { %3686 = vmatprep.subr.bf16.mxu1 %v4065_v1 }
 0x5d9   : > { %3687 = vmatpush3.bf16.msra.mxu1 %v3793_v60 }
 0x5da   : > { %3688 = vmatprep.subr.bf16.mxu1 %v4065_v1 }
 0x5dd   : > { %3689 = vmatpush3.bf16.msra.mxu1 %v3794_v24 }
 0x5de   : > { %3690 = vmatprep.subr.bf16.mxu1 %v4065_v1 }
 0x5e1   : > { %3691 = vmatpush3.bf16.msra.mxu1 %v3795_v25 }
 0x6a7   : > { %v2932_v0 = vpop.f32.mrb[32].mxu1 }
 0x6a8   : > { %v2933_v63 = vadd.f32 %v3489_v11, %v2932_v0  ;;  %v3674_v17 = vpop.f32.mrb[33].mxu1 }
 0x6a9   : > { %v2935_v37 = vpop.f32.mrb[34].mxu1 }
 0x6aa   : > { %v2936_v39 = vadd.f32 %v3489_v11, %v2935_v37  ;;  %v3675_v40 = vpop.f32.mrb[35].mxu1  ;;  %v2939_v44 = vadd.f32 %v3836_v41, %v2933_v63 }
 0x6ac   : > { %v2943_v45 = vsel %vm749_vm1, %v2939_v44, 0.0  ;;  %v2940_v43 = vadd.f32 %v3837_v42, %v2936_v39 }
 0x6ad   : > { %2944 = vadd.xlane.f32.xlu1 %v2943_v45 }
 0x6ae   : > { %v2946_v46 = vsel %vm749_vm1, %v2940_v43, 0.0 }
 0x6af   : > { %2947 = vadd.xlane.f32.xlu0 %v2946_v46 }
 0x73a   : > { %v2945_v47 = vpop.xlane.xlu1 %2944 }
 0x73b   : > { %v2950_v48 = vmul.f32 0.03125, %v2945_v47 }
 0x73c   : > { %v2948_v23 = vpop.xlane.xlu0 %2947 }
 0x73d   : > { %v2952_v27 = vsub.f32 %v2939_v44, %v2950_v48  ;;  %v2951_v49 = vmul.f32 0.03125, %v2948_v23 }
 0x73f   : > { %v2953_v50 = vsub.f32 %v2940_v43, %v2951_v49  ;;  %v2954_v51 = vmul.f32 %v2952_v27, %v2952_v27 }
 0x741   : > { %v2956_v7 = vsel %vm749_vm1, %v2954_v51, 0.0  ;;  %v2955_v8 = vmul.f32 %v2953_v50, %v2953_v50 }
 0x742   : > { %2957 = vadd.xlane.f32.xlu0 %v2956_v7  ;;  %v3505_v7 = vld [vmem:[%s700_s0] ss:$0 sm:$0xff] }
 0x743   : > { %v2959_v56 = vsel %vm749_vm1, %v2955_v8, 0.0 }
 0x744   : > { %2960 = vadd.xlane.f32.xlu1 %v2959_v56 }
 0x7cf   : > { %v2958_v61 = vpop.xlane.xlu0 %2957 }
 0x7d0   : > { %v2962_v5 = vmul.f32 0.03125, %v2958_v61 }
 0x7d1   : > { %v2961_v6 = vpop.xlane.xlu1 %2960 }
 0x7d2   : > { %v2964_v10 = vadd.f32 1e-05, %v2962_v5  ;;  %v2963_v15 = vmul.f32 0.03125, %v2961_v6 }
 0x7d4   : > { %3828 = vrsqrt.f32 %v2964_v10  ;;  %v2965_v16 = vadd.f32 1e-05, %v2963_v15 }
 0x7d6   : > { %3830 = vrsqrt.f32 %v2965_v16 }
 0x7de   : > { %v3829_v21 = vpop.eup %3828 }
 0x7df   : > { %v2968_v19 = vmul.f32 %v3829_v21, %v2952_v27 }
 0x7e0   : > { %v3831_v52 = vpop.eup %3830 }
 0x7e1   : > { %v2976_v53 = vmul.f32 %v3493_v22, %v2968_v19  ;;  %v2969_v54 = vmul.f32 %v3831_v52, %v2953_v50 }
 0x7e3   : > { %v2977_v9 = vmul.f32 %v3493_v22, %v2969_v54  ;;  %v2984_v2 = vadd.f32 %v3494_v55, %v2976_v53 }
 0x7e5   : > { %v2985_v3 = vadd.f32 %v3494_v55, %v2977_v9 }
 0x7e7   : > { %v2986_v31 = vpack.c.bf16 %v2985_v3, %v2984_v2 }
 0x7e9   : > { %3681 = vmatmul.mubr.msk.bf16.vlgmr.msra.gmra.mrb[36].mxu0 %vm749_vm1, %v2986_v31 }
 0x8bc   : > { %v3047_v26 = vpop.f32.mrb[36].mxu0 }
 0x8bd   : > { %v3048_v28 = vadd.f32 %v3495_v38, %v3047_v26  ;;  %v3682_v29 = vpop.f32.mrb[37].mxu0 }
 0x8be   : > { %v3050_v30 = vpop.f32.mrb[38].mxu0 }
 0x8bf   : > { %v3051_v12 = vadd.f32 %v3495_v38, %v3050_v30  ;;  %v3683_v32 = vpop.f32.mrb[39].mxu0  ;;  %v3054_v62 = vmax.f32 %v3048_v28, 0.0  ;;  %v3508_v28 = vld [vmem:[%s4986_s30] ss:$0 sm:$0xff] (!%p3507_p1) }
 0x8c0   : > { %v3509_v30 = vld [vmem:[%s4987_s12] ss:$0 sm:$0xff] (!%p3507_p1) }
 0x8c1   : > { %v3055_v4 = vmax.f32 %v3051_v12, 0.0 }
 0x8c3   : > { %v3056_v13 = vpack.c.bf16 %v3055_v4, %v3054_v62 }
 0x8c5   : > { %3693 = vmatmul.mubr.msk.bf16.vlgmr.msra.gmra.mrb[36].mxu1 %vm3096_vm7, %v3056_v13 }
 0x998   : > { %v3134_v1 = vpop.f32.mrb[36].mxu1 }
 0x999   : > { %v3135_v33 = vadd.f32 %v3499_v14, %v3134_v1  ;;  %v3694_v34 = vpop.f32.mrb[37].mxu1 }
 0x99a   : > { %v3137_v18 = vpop.f32.mrb[38].mxu1 }
 0x99b   : > { %v3138_v35 = vadd.f32 %v3499_v14, %v3137_v18  ;;  %v3695_v36 = vpop.f32.mrb[39].mxu1  ;;  %v3141_v20 = vadd.f32 %v3135_v33, %v2984_v2 }
 0x99d   : > { %v3145_v11 = vsel %vm749_vm1, %v3141_v20, 0.0  ;;  %v3142_v0 = vadd.f32 %v3138_v35, %v2985_v3 }
 0x99e   : > { %3146 = vadd.xlane.f32.xlu0 %v3145_v11 }
 0x99f   : > { %v3148_v63 = vsel %vm749_vm1, %v3142_v0, 0.0 }
 0x9a0   : > { %3149 = vadd.xlane.f32.xlu1 %v3148_v63 }
 0xa2b   : > { %v3147_v17 = vpop.xlane.xlu0 %3146 }
 0xa2c   : > { %v3151_v37 = vmul.f32 0.03125, %v3147_v17 }
 0xa2d   : > { %v3150_v39 = vpop.xlane.xlu1 %3149 }
 0xa2e   : > { %v3153_v40 = vsub.f32 %v3141_v20, %v3151_v37  ;;  %v3152_v41 = vmul.f32 0.03125, %v3150_v39 }
 0xa30   : > { %v3154_v44 = vsub.f32 %v3142_v0, %v3152_v41  ;;  %v3155_v45 = vmul.f32 %v3153_v40, %v3153_v40 }
 0xa32   : > { %v3157_v42 = vsel %vm749_vm1, %v3155_v45, 0.0  ;;  %v3156_v43 = vmul.f32 %v3154_v44, %v3154_v44 }
 0xa33   : > { %3158 = vadd.xlane.f32.xlu0 %v3157_v42 }
 0xa34   : > { %v3160_v46 = vsel %vm749_vm1, %v3156_v43, 0.0 }
 0xa35   : > { %3161 = vadd.xlane.f32.xlu1 %v3160_v46 }
 0xac0   : > { %v3159_v47 = vpop.xlane.xlu0 %3158 }
 0xac1   : > { %v3163_v48 = vmul.f32 0.03125, %v3159_v47 }
 0xac2   : > { %v3162_v23 = vpop.xlane.xlu1 %3161 }
 0xac3   : > { %v3165_v27 = vadd.f32 1e-05, %v3163_v48  ;;  %v3164_v49 = vmul.f32 0.03125, %v3162_v23 }
 0xac5   : > { %3832 = vrsqrt.f32 %v3165_v27  ;;  %v3166_v50 = vadd.f32 1e-05, %v3164_v49 }
 0xac7   : > { %3834 = vrsqrt.f32 %v3166_v50 }
 0xacf   : > { %v3833_v51 = vpop.eup %3832 }
 0xad0   : > { %v3169_v8 = vmul.f32 %v3833_v51, %v3153_v40 }
 0xad1   : > { %v3835_v56 = vpop.eup %3834 }
 0xad2   : > { %v3177_v58 = vmul.f32 %v3505_v7, %v3169_v8  ;;  %v3170_v59 = vmul.f32 %v3835_v56, %v3154_v44  ;;  %3192 = sbr.rel (%p3507_p1) target bundleno = 3092 (0xc14), region = 105 }
 0xad4   : > { %v3185_v60 = vadd.f32 %v3506_v57, %v3177_v58  ;;  %v3178_v61 = vmul.f32 %v3505_v7, %v3170_v59 }
 0xad6   : > { %3187 = vst.msk [vmem:[#allocation2] sm:$0xff] %vm749_vm1, %v3185_v60  ;;  %v3186_v5 = vadd.f32 %v3506_v57, %v3178_v61  ;;  %v3195_v6 = vsel (!%p3507_p1), %vm749_vm1, %v3185_v60, 0.0 }
 0xad7   : > { %3196 = vadd.xlane.f32.xlu0 (!%p3507_p1), %v3195_v6 }
 0xad8   : > { %3188 = vst.msk [vmem:[#allocation2 + $0x8] sm:$0xff] %vm749_vm1, %v3186_v5  ;;  %v3198_v10 = vsel (!%p3507_p1), %vm749_vm1, %v3186_v5, 0.0 }
 0xadb   : > { %3199 = vadd.xlane.f32.xlu0 %v3198_v10 }
 0xb64   : > { %v3197_v15 = vpop.xlane.xlu0 %3196 }
 0xb65   : > { %v3201_v16 = vmul.f32 0.03125, %v3197_v15 }
 0xb67   : > { %v3203_v21 = vsub.f32 %v3185_v60, %v3201_v16 }
 0xb68   : > { %v3200_v22 = vpop.xlane.xlu0 %3199 }
 0xb69   : > { %v3202_v19 = vmul.f32 0.03125, %v3200_v22  ;;  %v3205_v52 = vmul.f32 %v3203_v21, %v3203_v21 }
 0xb6b   : > { %v3204_v53 = vsub.f32 %v3186_v5, %v3202_v19  ;;  %v3207_v54 = vsel %vm749_vm1, %v3205_v52, 0.0 }
 0xb6c   : > { %3208 = vadd.xlane.f32.xlu1 %v3207_v54 }
 0xb6d   : > { %v3206_v55 = vmul.f32 %v3204_v53, %v3204_v53 }
 0xb6f   : > { %v3210_v9 = vsel %vm749_vm1, %v3206_v55, 0.0 }
 0xb70   : > { %3211 = vadd.xlane.f32.xlu1 %v3210_v9 }
 0xbf9   : > { %v3209_v2 = vpop.xlane.xlu1 %3208 }
 0xbfa   : > { %v3213_v3 = vmul.f32 0.03125, %v3209_v2 }
 0xbfc   : > { %v3215_v31 = vadd.f32 1e-05, %v3213_v3 }
 0xbfd   : > { %v3212_v24 = vpop.xlane.xlu1 %3211 }
 0xbfe   : > { %3838 = vrsqrt.f32 %v3215_v31  ;;  %v3214_v25 = vmul.f32 0.03125, %v3212_v24 }
 0xc00   : > { %v3216_v38 = vadd.f32 1e-05, %v3214_v25 }
 0xc02   : > { %3840 = vrsqrt.f32 %v3216_v38 }
 0xc08   : > { %v3839_v26 = vpop.eup %3838 }
 0xc09   : > { %v3219_v29 = vmul.f32 %v3839_v26, %v3203_v21 }
 0xc0b   : > { %v3227_v12 = vmul.f32 %v3508_v28, %v3219_v29 }
 0xc0c   : > { %v3841_v32 = vpop.eup %3840 }
 0xc0d   : > { %v3235_v62 = vadd.f32 %v3509_v30, %v3227_v12  ;;  %v3220_v4 = vmul.f32 %v3841_v32, %v3204_v53 }
 0xc0f   : > { %3237 = vst.msk [vmem:[#allocation11] sm:$0xff] %vm749_vm1, %v3235_v62  ;;  %v3228_v13 = vmul.f32 %v3508_v28, %v3220_v4 }
 0xc11   : > { %v3236_v14 = vadd.f32 %v3509_v30, %v3228_v13 }
 0xc13   : > { %3238 = vst.msk [vmem:[#allocation11 + $0x8] sm:$0xff] %vm749_vm1, %v3236_v14 }
 0xc14 PF: > { %p3722_p13 = scmp.eq.s32.totalorder %s4178_s22, 1  ;;  %s4077_s28 = smov [#allocation11]  }
 0xc15   : > { %s3245_s23 = sshll.u32 %s4077_s28, 4  ;;  %s3246_s23 = int_to_ptr.vmem [resolvable:$true] %s3245_s23 }
 0xc16   : > { %s3984_s29 = scalar_lea.vmem %s3246_s23, 256  ;;  %p3991_p7 = scmp.lt.s32.totalorder %s3246_s23, %s3246_s23 }
 0xc17   : > { %p3985_p0 = scmp.ne.s32.totalorder %s3246_s23, %s3984_s29  ;;  %p3992_p2 = scmp.lt.s32.totalorder %s3984_s29, %s3984_s29 }
 0xc19   : > { %p3986_p11 = pnand %p3985_p0, %p3722_p13  ;;  %p3993_p3 = por %p3992_p2, %p3991_p7 }
 0xc1b   : > { %p3987_p12 = pneg %p3986_p11 }
 0xc1d   : > { %p3994_p5 = pnand %p3993_p3, %p3987_p12 }
 0xc1f   : > { %3997 = shalt.err (!%p3994_p5)
}
 0xc20   : > { %s4988_s3 = sld [smem:[#allocation33_spill]] }
 0xc26   : > { %s3998_s21 = scalar_lea.hbm %s4988_s3, 256 }
 0xc27   : > { %p3999_p8 = scmp.ne.s32.totalorder %s4988_s3, %s3998_s21  ;;  %p4004_p6 = scmp.lt.u32.totalorder %s3998_s21, %s4988_s3 }
 0xc29   : > { %p4000_p9 = pnand %p3999_p8, %p3722_p13 }
 0xc2b   : > { %p4001_p10 = pneg %p4000_p9 }
 0xc2d   : > { %p4006_p4 = pnand %p4004_p6, %p4001_p10 }
 0xc2f   : > { %4009 = shalt.err (!%p4006_p4)
}
 0xc30   : > { %s4078_s26 = smov 128  }
 0xc31   : > { %3705 = dma.vmem_to_hbm [thread:$0]  (%p3722_p13), %s3246_s23, 256, %s4988_s3, [#allocation5], %s4078_s26, %s4078_s26, %s4075_s25  }
 0xc32   : > { %4041 = dma.done.wait (%p3722_p13), [#allocation5], 256  }
 0xc33   : > { %4043 = vsyncadd (%p3722_p13), [#allocation5], 4294967040 }
 0xc34 PF: > { %s4989_s21 = sld [smem:[#allocation23_spill]]  ;;  %s4990_s5 = sld [smem:[#allocation22_spill]] }
 0xc35   : > { %s4991_s20 = sld [smem:[#allocation24_spill]]  ;;  %s4992_s18 = smov %s4050_s19 }
 0xc3a   : > { %p32_p1 = scmp.ge.s32.totalorder %s4989_s21, 4   ;;  %s4993_s19 = smov %s4990_s5 }
 0xc3c   :  { %34 = sbr.rel (!%p32_p1) target bundleno = 18 (0x12), region = 187 }
 0xc43   :  { %3261 = vsyncpa [#allocation4], 1 }
 0xc44   :  { %3263 = vsyncpa [#allocation4 + $0x1], 1 }
 0xc45   :  { %3264 = vsyncpa [#allocation7], 1 }
 0xc46   :  { %3266 = vsyncpa [#allocation7 + $0x1], 1 }
 0xc47   :  { %3267 = vsyncpa [#allocation10], 1 }
 0xc48   :  { %3269 = vsyncpa [#allocation10 + $0x1], 1 }
 0xc49   :  { %3270 = vsyncpa [#allocation5], 1 }
 0xc4a   :  { %3272 = vsyncpa [#allocation5 + $0x1], 1 }

</bundles_post_ra>
